<compile_context>
chip_gen: v7x
topology: tpu7x:2x2x1
jax: 0.10.0
libtpu: 0.0.40
codegen_flags: <defaults>
</compile_context>

<pallas_src>
import numpy as np
import jax
import jax.numpy as jnp
from jax import lax
from jax.experimental import pallas as pl
from jax.experimental.pallas import tpu as pltpu


def _bilstm_rec_kernel(lens_ref, gxc_ref, ublk_ref, out_ref):
    """Fused bidirectional LSTM recurrence (one time loop for both directions).

    lens_ref: (Bt, 1)  int32   valid lengths for this batch tile.
    gxc_ref : (T, Bt, 8H) bf16  precomputed x-projection + fused biases.
              Columns per-gate fwd/bwd interleaved
              [i_f,i_b, f_f,f_b, o_f,o_b, g_f,g_b]; the bwd halves are already
              time-reversed, so at step s the fwd columns belong to time s and
              the bwd columns to time T-1-s.
    ublk_ref: (2H, 8H) bf16 block-diagonal recurrent weights, rows [h_f | h_b],
              same column layout as gxc.
    out_ref : (T, Bt, 2H) f32; [..., :H] = fwd hidden, [..., H:] = bwd hidden.
    """
    T, Bt, G = gxc_ref.shape
    H2 = G // 4          # 2H (both directions stacked)
    H = H2 // 2

    u_blk = ublk_ref[...]                                    # bf16, loaded once
    lens = jnp.broadcast_to(lens_ref[...], (Bt, H2))         # hoisted broadcast
    col = lax.broadcasted_iota(jnp.int32, (Bt, H2), 1)
    is_fwd = col < H                                         # loop-invariant

    def body(s, carry):
        h, c = carry                                         # (Bt, 2H) f32
        gx = gxc_ref[s].astype(jnp.float32)                  # bf16 slab -> f32
        # single small bf16 MXU op serves both directions; f32 accumulate
        gates = gx + jnp.dot(h.astype(jnp.bfloat16), u_blk,
                             preferred_element_type=jnp.float32)
        sg = jax.nn.sigmoid(gates[:, : 3 * H2])              # i, f, o  (1 EUP push)
        g = jnp.tanh(gates[:, 3 * H2:])                      # g        (1 EUP push)
        i = sg[:, 0:H2]
        f = sg[:, H2: 2 * H2]
        o = sg[:, 2 * H2: 3 * H2]
        c_new = f * c + i * g
        h_new = o * jnp.tanh(c_new)
        # time index seen by each half at this step (fwd: s, bwd: T-1-s)
        t_vec = jnp.where(is_fwd, s, T - 1 - s)
        valid = t_vec < lens
        h = jnp.where(valid, h_new, h)                       # hold state when padded
        c = jnp.where(valid, c_new, c)
        h_out = jnp.where(valid, h_new, 0.0)                 # zero output when padded
        out_ref[s, :, 0:H] = h_out[:, 0:H]                   # fwd @ time s
        out_ref[T - 1 - s, :, H: 2 * H] = h_out[:, H: 2 * H]  # bwd @ time T-1-s
        return h, c

    zeros = jnp.zeros((Bt, H2), jnp.float32)
    lax.fori_loop(0, T, body, (zeros, zeros), unroll=min(T, 8))


def init_params(key, input_dim, output_dim):
    """Raw nn.LSTM-layout params: (4H, D)/(4H, H)/(4H,), gate order [i, f, g, o],
    U(-1/sqrt(H), 1/sqrt(H)) like PyTorch."""
    H = output_dim // 2
    bound = 1.0 / np.sqrt(H)
    keys = jax.random.split(key, 8)

    def u(kk, shape):
        return jax.random.uniform(kk, shape, jnp.float32, -bound, bound)

    return {
        "wih_f": u(keys[0], (4 * H, input_dim)),
        "whh_f": u(keys[1], (4 * H, H)),
        "bih_f": u(keys[2], (4 * H,)),
        "bhh_f": u(keys[3], (4 * H,)),
        "wih_b": u(keys[4], (4 * H, input_dim)),
        "whh_b": u(keys[5], (4 * H, H)),
        "bih_b": u(keys[6], (4 * H,)),
        "bhh_b": u(keys[7], (4 * H,)),
    }


def _reorder_ifog(m):
    """Rows blocked [i, f, g, o] (PyTorch order) -> [i, f, o, g]."""
    i, f, g, o = jnp.split(m, 4, axis=0)
    return jnp.concatenate([i, f, o, g], axis=0)


def prepare_kernel_params(raw):
    """Build the kernel weight layout from raw PyTorch-style params."""
    H = raw["whh_f"].shape[1]
    D = raw["wih_f"].shape[1]
    w_f = _reorder_ifog(raw["wih_f"]).T                       # (D, 4H) cols [i,f,o,g]
    w_b = _reorder_ifog(raw["wih_b"]).T
    b_f = _reorder_ifog((raw["bih_f"] + raw["bhh_f"])[:, None])[:, 0]   # fused bias (4H,)
    b_b = _reorder_ifog((raw["bih_b"] + raw["bhh_b"])[:, None])[:, 0]

    # Single fused input-projection weight with per-gate interleaved columns:
    #   [i_f,i_b, f_f,f_b, o_f,o_b, g_f,g_b]  -> (D, 8H), stored in bf16.
    w_cat = jnp.stack([w_f.reshape(D, 4, H), w_b.reshape(D, 4, H)],
                      axis=2).reshape(D, 8 * H)
    b_cat = jnp.stack([b_f.reshape(4, H), b_b.reshape(4, H)],
                      axis=1).reshape(8 * H)

    # Block-diagonal recurrent weight, rows [h_f | h_b], same column layout (bf16).
    u_f = _reorder_ifog(raw["whh_f"]).T                       # (H, 4H)
    u_b = _reorder_ifog(raw["whh_b"]).T
    u_f_g = u_f.reshape(H, 4, H)
    u_b_g = u_b.reshape(H, 4, H)
    zeros = jnp.zeros_like(u_f_g)
    top = jnp.stack([u_f_g, zeros], axis=2).reshape(H, 8 * H)
    bot = jnp.stack([zeros, u_b_g], axis=2).reshape(H, 8 * H)
    u_blk = jnp.concatenate([top, bot], axis=0)               # (2H, 8H)

    return {
        "w_cat": w_cat.astype(jnp.bfloat16),
        "b_cat": b_cat.astype(jnp.float32),
        "u_blk": u_blk.astype(jnp.bfloat16),
    }


def _pick_batch_tile(B, T, H, *, vmem_budget=24 << 20):
    """VMEM-budgeted batch tile: multiple of 8 (or B), divides B, fits
    double-buffered gxc(bf16)+out(f32) tiles + weights; prefers >=2 tiles so the
    'parallel' grid axis can shard across TensorCores (v7x megacore)."""
    H2 = 2 * H

    def fits(bt):
        tile_bytes = (2 * (T * bt * 4 * H2 * 2)      # gxc block, bf16, double-buffered
                      + 2 * (T * bt * H2 * 4)        # out block, f32, double-buffered
                      + H2 * 4 * H2 * 2)             # recurrent weights, bf16
        return tile_bytes <= vmem_budget and bt * H2 <= 8192   # vreg-pressure cap

    cands = [bt for bt in range(8, B, 8) if B % bt == 0] + [B]
    good = [bt for bt in cands if fits(bt)]
    if not good:
        return min(cands)
    two_tile = [bt for bt in good if bt <= B // 2]
    return max(two_tile) if two_tile else max(good)


def bilstm_embedding(x, x_len, kparams, *, batch_tile=None):
    """x: (B, T, D) float, x_len: (B,) host-concrete lengths.
    Returns (B, max(x_len), 2H) batch_first, like pad_packed_sequence."""
    B, T, D = x.shape
    u_blk = kparams["u_blk"]
    H = u_blk.shape[0] // 2
    lens_np = np.asarray(x_len)
    max_len = int(lens_np.max())  # TODO(synk): needs host-concrete lengths (same as pad_packed_sequence)

    # Hoisted input projection: ONE bf16 GEMM over x, f32 accumulation, fused biases.
    # Column layout (per-gate fwd/bwd interleaved) is already baked into w_cat.
    x_tm = jnp.transpose(x, (1, 0, 2)).astype(jnp.bfloat16)   # (T, B, D) time-major
    gx = jnp.einsum('tbd,dg->tbg', x_tm, kparams["w_cat"],
                    preferred_element_type=jnp.float32) + kparams["b_cat"]
    # Time-reverse only the backward-direction columns (one elementwise pass).
    gx = gx.reshape(T, B, 4, 2, H)
    gx = jnp.concatenate(
        [gx[:, :, :, 0:1, :], jnp.flip(gx[:, :, :, 1:2, :], axis=0)], axis=3)
    gxc = gx.reshape(T, B, 8 * H).astype(jnp.bfloat16)        # bf16 storage

    lens = jnp.asarray(lens_np, jnp.int32).reshape(B, 1)

    bt = _pick_batch_tile(B, T, H) if batch_tile is None else batch_tile
    assert B % bt == 0, "batch_tile must divide B"
    assert bt == B or bt % 8 == 0, "batch_tile must be a multiple of 8 when tiling"
    grid = (B // bt,)

    # TODO(synk): for long T, stream gxc/out time-chunks via memory_space=pl.ANY
    # + pltpu.emit_pipeline instead of holding the full (T, bt, *) blocks in VMEM.
    out = pl.pallas_call(
        _bilstm_rec_kernel,
        out_shape=jax.ShapeDtypeStruct((T, B, 2 * H), jnp.float32),
        grid=grid,
        in_specs=[
            pl.BlockSpec((bt, 1), lambda b: (b, 0)),            # lengths
            pl.BlockSpec((T, bt, 8 * H), lambda b: (0, b, 0)),  # precomputed gates_x (bf16)
            pl.BlockSpec((2 * H, 8 * H), lambda b: (0, 0)),     # recurrent weights (bf16)
        ],
        out_specs=pl.BlockSpec((T, bt, 2 * H), lambda b: (0, b, 0)),
        compiler_params=pltpu.CompilerParams(
            dimension_semantics=("parallel",)),
    )(lens, gxc, u_blk)

    out = jnp.transpose(out, (1, 0, 2))                        # batch_first (B, T, 2H)
    return out[:, :max_len, :]


def _ref_bilstm(x, x_len, raw):
    """Pure-numpy reference with PyTorch packed-sequence semantics (raw layout)."""
    x = np.asarray(x, np.float64)
    lens = np.asarray(x_len)
    B, T, D = x.shape
    H = np.asarray(raw["whh_f"]).shape[1]
    p = {k: np.asarray(v, np.float64) for k, v in raw.items()}

    def sig(z):
        return 1.0 / (1.0 + np.exp(-z))

    def cell(xt, h, c, wih, whh, b):
        g = wih @ xt + whh @ h + b
        i, f, gg, o = g[0:H], g[H:2 * H], g[2 * H:3 * H], g[3 * H:4 * H]
        c = sig(f) * c + sig(i) * np.tanh(gg)
        h = sig(o) * np.tanh(c)
        return h, c

    bf = p["bih_f"] + p["bhh_f"]
    bb = p["bih_b"] + p["bhh_b"]
    out = np.zeros((B, T, 2 * H))
    for b in range(B):
        L = int(lens[b])
        h = np.zeros(H); c = np.zeros(H)
        for t in range(L):
            h, c = cell(x[b, t], h, c, p["wih_f"], p["whh_f"], bf)
            out[b, t, :H] = h
        h = np.zeros(H); c = np.zeros(H)
        for t in range(L - 1, -1, -1):
            h, c = cell(x[b, t], h, c, p["wih_b"], p["whh_b"], bb)
            out[b, t, H:] = h
    return out[:, :int(lens.max()), :]


if __name__ == "__main__":
    B, T, D = 16, 8, 16
    output_dim = 32            # hidden per direction H = 16
    # NOTE: dropout in the module is a no-op for a 1-layer nn.LSTM.

    key = jax.random.PRNGKey(0)
    kx, kp = jax.random.split(key)
    x = jax.random.normal(kx, (B, T, D), jnp.float32)
    x_len = np.array([8, 6, 5, 3, 8, 7, 2, 4, 8, 1, 6, 5, 3, 8, 7, 4],
                     dtype=np.int32)

    raw = init_params(kp, D, output_dim)
    kparams = prepare_kernel_params(raw)

    out = bilstm_embedding(x, x_len, kparams)        # auto batch_tile=8 -> grid=(2,)
    out = jax.block_until_ready(out)

    ref = _ref_bilstm(np.asarray(x), x_len, raw)
    assert out.shape == ref.shape, (out.shape, ref.shape)
    # bf16 matmul operands / bf16 gxc storage -> relaxed tolerance vs f64 reference.
    np.testing.assert_allclose(np.asarray(out), ref, rtol=5e-2, atol=3e-2)
    print("KERNEL_OK")
</pallas_src>

<mosaic_0001>
module attributes {stable_mosaic.version = 11 : i64} {
  func.func @_bilstm_rec_kernel(%arg0: i32, %arg1: memref<8x1xi32, #tpu.memory_space<vmem>>, %arg2: memref<8x8x128xbf16, #tpu.memory_space<vmem>>, %arg3: memref<32x128xbf16, #tpu.memory_space<vmem>>, %arg4: memref<8x8x32xf32, #tpu.memory_space<vmem>>) attributes {dimension_semantics = [#tpu.dimension_semantics<parallel>], iteration_bounds = array<i64: 2>, scalar_prefetch = 0 : i64, scratch_operands = 0 : i64, tpu.core_type = #tpu.core_type<tc>, window_params = [{transform_indices = @transform_0, window_bounds = array<i64: 8, 1>}, {transform_indices = @transform_1, window_bounds = array<i64: 8, 8, 128>}, {pipeline_mode = #tpu.pipeline_mode<synchronous>, transform_indices = @transform_2, window_bounds = array<i64: 32, 128>}, {transform_indices = @transform_3, window_bounds = array<i64: 8, 8, 32>}]} {
    %c0 = arith.constant 0 : index
    %c0_0 = arith.constant 0 : index
    %0 = vector.load %arg3[%c0, %c0_0] : memref<32x128xbf16, #tpu.memory_space<vmem>>, vector<32x128xbf16>
    %c0_1 = arith.constant 0 : index
    %c0_2 = arith.constant 0 : index
    %1 = vector.load %arg1[%c0_1, %c0_2] : memref<8x1xi32, #tpu.memory_space<vmem>>, vector<8x1xi32>
    %2 = vector.shape_cast %1 : vector<8x1xi32> to vector<8x1xi32>
    %3 = vector.broadcast %2 : vector<8x1xi32> to vector<8x32xi32>
    %4 = tpu.iota {dimensions = array<i32: 1>} : vector<8x32xi32>
    %c16_i32 = arith.constant 16 : i32
    %5 = vector.broadcast %c16_i32 : i32 to vector<8x32xi32>
    %6 = arith.cmpi slt, %4, %5 : vector<8x32xi32>
    %cst = arith.constant 0.000000e+00 : f32
    %7 = vector.broadcast %cst : f32 to vector<8x32xf32>
    %c0_i32 = arith.constant 0 : i32
    %8 = arith.index_cast %c0_i32 : i32 to index
    %c0_3 = arith.constant 0 : index
    %c0_4 = arith.constant 0 : index
    %9 = vector.load %arg2[%8, %c0_3, %c0_4] : memref<8x8x128xbf16, #tpu.memory_space<vmem>>, vector<1x8x128xbf16>
    %10 = vector.shape_cast %9 : vector<1x8x128xbf16> to vector<8x128xbf16>
    %11 = arith.extf %10 : vector<8x128xbf16> to vector<8x128xf32>
    %12 = arith.truncf %7 : vector<8x32xf32> to vector<8x32xbf16>
    %cst_5 = arith.constant dense<0.000000e+00> : vector<8x128xf32>
    %13 = tpu.matmul %12, %0, %cst_5 {dimension_numbers = #tpu.dot_dimension_numbers<[1], [0], [0], [1], [0, 0, 1, 1], [], []>} : vector<8x32xbf16>, vector<32x128xbf16>, vector<8x128xf32> -> vector<8x128xf32>
    %14 = arith.addf %11, %13 : vector<8x128xf32>
    %15 = vector.extract_strided_slice %14 {offsets = [0, 0], sizes = [8, 96], strides = [1, 1]} : vector<8x128xf32> to vector<8x96xf32>
    %16 = arith.negf %15 : vector<8x96xf32>
    %17 = math.exp %16 : vector<8x96xf32>
    %cst_6 = arith.constant 1.000000e+00 : f32
    %18 = vector.broadcast %cst_6 : f32 to vector<8x96xf32>
    %19 = arith.addf %18, %17 : vector<8x96xf32>
    %20 = arith.divf %18, %19 : vector<8x96xf32>
    %21 = vector.extract_strided_slice %14 {offsets = [0, 96], sizes = [8, 32], strides = [1, 1]} : vector<8x128xf32> to vector<8x32xf32>
    %22 = math.tanh %21 : vector<8x32xf32>
    %23 = vector.extract_strided_slice %20 {offsets = [0, 0], sizes = [8, 32], strides = [1, 1]} : vector<8x96xf32> to vector<8x32xf32>
    %24 = vector.extract_strided_slice %20 {offsets = [0, 32], sizes = [8, 32], strides = [1, 1]} : vector<8x96xf32> to vector<8x32xf32>
    %25 = vector.extract_strided_slice %20 {offsets = [0, 64], sizes = [8, 32], strides = [1, 1]} : vector<8x96xf32> to vector<8x32xf32>
    %26 = arith.mulf %24, %7 : vector<8x32xf32>
    %27 = arith.mulf %23, %22 : vector<8x32xf32>
    %28 = arith.addf %26, %27 : vector<8x32xf32>
    %29 = math.tanh %28 : vector<8x32xf32>
    %30 = arith.mulf %25, %29 : vector<8x32xf32>
    %c7_i32 = arith.constant 7 : i32
    %31 = arith.subi %c7_i32, %c0_i32 : i32
    %32 = vector.broadcast %c0_i32 : i32 to vector<8x32xi32>
    %33 = vector.broadcast %31 : i32 to vector<8x32xi32>
    %34 = arith.select %6, %32, %33 : vector<8x32xi1>, vector<8x32xi32>
    %35 = arith.cmpi slt, %34, %3 : vector<8x32xi32>
    %36 = arith.select %35, %30, %7 : vector<8x32xi1>, vector<8x32xf32>
    %37 = arith.select %35, %28, %7 : vector<8x32xi1>, vector<8x32xf32>
    %cst_7 = arith.constant 0.000000e+00 : f32
    %38 = vector.broadcast %cst_7 : f32 to vector<8x32xf32>
    %39 = arith.select %35, %30, %38 : vector<8x32xi1>, vector<8x32xf32>
    %40 = vector.extract_strided_slice %39 {offsets = [0, 0], sizes = [8, 16], strides = [1, 1]} : vector<8x32xf32> to vector<8x16xf32>
    %41 = arith.index_cast %c0_i32 : i32 to index
    %c0_8 = arith.constant 0 : index
    %c0_9 = arith.constant 0 : index
    %42 = vector.load %arg4[%41, %c0_8, %c0_9] : memref<8x8x32xf32, #tpu.memory_space<vmem>>, vector<1x8x16xf32>
    %43 = vector.shape_cast %42 : vector<1x8x16xf32> to vector<8x16xf32>
    %44 = vector.shape_cast %40 : vector<8x16xf32> to vector<1x8x16xf32>
    tpu.vector_store %arg4[%41, %c0_8, %c0_9], %44 {strides = array<i32>} : memref<8x8x32xf32, #tpu.memory_space<vmem>>, vector<1x8x16xf32>,
    %45 = vector.extract_strided_slice %39 {offsets = [0, 16], sizes = [8, 16], strides = [1, 1]} : vector<8x32xf32> to vector<8x16xf32>
    %c7_i32_10 = arith.constant 7 : i32
    %46 = arith.subi %c7_i32_10, %c0_i32 : i32
    %47 = arith.index_cast %46 : i32 to index
    %c0_11 = arith.constant 0 : index
    %c16 = arith.constant 16 : index
    %48 = vector.load %arg4[%47, %c0_11, %c16] : memref<8x8x32xf32, #tpu.memory_space<vmem>>, vector<1x8x16xf32>
    %49 = vector.shape_cast %48 : vector<1x8x16xf32> to vector<8x16xf32>
    %50 = vector.shape_cast %45 : vector<8x16xf32> to vector<1x8x16xf32>
    tpu.vector_store %arg4[%47, %c0_11, %c16], %50 {strides = array<i32>} : memref<8x8x32xf32, #tpu.memory_space<vmem>>, vector<1x8x16xf32>,
    %c1_i32 = arith.constant 1 : i32
    %51 = arith.index_cast %c1_i32 : i32 to index
    %c0_12 = arith.constant 0 : index
    %c0_13 = arith.constant 0 : index
    %52 = vector.load %arg2[%51, %c0_12, %c0_13] : memref<8x8x128xbf16, #tpu.memory_space<vmem>>, vector<1x8x128xbf16>
    %53 = vector.shape_cast %52 : vector<1x8x128xbf16> to vector<8x128xbf16>
    %54 = arith.extf %53 : vector<8x128xbf16> to vector<8x128xf32>
    %55 = arith.truncf %36 : vector<8x32xf32> to vector<8x32xbf16>
    %cst_14 = arith.constant dense<0.000000e+00> : vector<8x128xf32>
    %56 = tpu.matmul %55, %0, %cst_14 {dimension_numbers = #tpu.dot_dimension_numbers<[1], [0], [0], [1], [0, 0, 1, 1], [], []>} : vector<8x32xbf16>, vector<32x128xbf16>, vector<8x128xf32> -> vector<8x128xf32>
    %57 = arith.addf %54, %56 : vector<8x128xf32>
    %58 = vector.extract_strided_slice %57 {offsets = [0, 0], sizes = [8, 96], strides = [1, 1]} : vector<8x128xf32> to vector<8x96xf32>
    %59 = arith.negf %58 : vector<8x96xf32>
    %60 = math.exp %59 : vector<8x96xf32>
    %cst_15 = arith.constant 1.000000e+00 : f32
    %61 = vector.broadcast %cst_15 : f32 to vector<8x96xf32>
    %62 = arith.addf %61, %60 : vector<8x96xf32>
    %63 = arith.divf %61, %62 : vector<8x96xf32>
    %64 = vector.extract_strided_slice %57 {offsets = [0, 96], sizes = [8, 32], strides = [1, 1]} : vector<8x128xf32> to vector<8x32xf32>
    %65 = math.tanh %64 : vector<8x32xf32>
    %66 = vector.extract_strided_slice %63 {offsets = [0, 0], sizes = [8, 32], strides = [1, 1]} : vector<8x96xf32> to vector<8x32xf32>
    %67 = vector.extract_strided_slice %63 {offsets = [0, 32], sizes = [8, 32], strides = [1, 1]} : vector<8x96xf32> to vector<8x32xf32>
    %68 = vector.extract_strided_slice %63 {offsets = [0, 64], sizes = [8, 32], strides = [1, 1]} : vector<8x96xf32> to vector<8x32xf32>
    %69 = arith.mulf %67, %37 : vector<8x32xf32>
    %70 = arith.mulf %66, %65 : vector<8x32xf32>
    %71 = arith.addf %69, %70 : vector<8x32xf32>
    %72 = math.tanh %71 : vector<8x32xf32>
    %73 = arith.mulf %68, %72 : vector<8x32xf32>
    %c7_i32_16 = arith.constant 7 : i32
    %74 = arith.subi %c7_i32_16, %c1_i32 : i32
    %75 = vector.broadcast %c1_i32 : i32 to vector<8x32xi32>
    %76 = vector.broadcast %74 : i32 to vector<8x32xi32>
    %77 = arith.select %6, %75, %76 : vector<8x32xi1>, vector<8x32xi32>
    %78 = arith.cmpi slt, %77, %3 : vector<8x32xi32>
    %79 = arith.select %78, %73, %36 : vector<8x32xi1>, vector<8x32xf32>
    %80 = arith.select %78, %71, %37 : vector<8x32xi1>, vector<8x32xf32>
    %cst_17 = arith.constant 0.000000e+00 : f32
    %81 = vector.broadcast %cst_17 : f32 to vector<8x32xf32>
    %82 = arith.select %78, %73, %81 : vector<8x32xi1>, vector<8x32xf32>
    %83 = vector.extract_strided_slice %82 {offsets = [0, 0], sizes = [8, 16], strides = [1, 1]} : vector<8x32xf32> to vector<8x16xf32>
    %84 = arith.index_cast %c1_i32 : i32 to index
    %c0_18 = arith.constant 0 : index
    %c0_19 = arith.constant 0 : index
    %85 = vector.load %arg4[%84, %c0_18, %c0_19] : memref<8x8x32xf32, #tpu.memory_space<vmem>>, vector<1x8x16xf32>
    %86 = vector.shape_cast %85 : vector<1x8x16xf32> to vector<8x16xf32>
    %87 = vector.shape_cast %83 : vector<8x16xf32> to vector<1x8x16xf32>
    tpu.vector_store %arg4[%84, %c0_18, %c0_19], %87 {strides = array<i32>} : memref<8x8x32xf32, #tpu.memory_space<vmem>>, vector<1x8x16xf32>,
    %88 = vector.extract_strided_slice %82 {offsets = [0, 16], sizes = [8, 16], strides = [1, 1]} : vector<8x32xf32> to vector<8x16xf32>
    %c7_i32_20 = arith.constant 7 : i32
    %89 = arith.subi %c7_i32_20, %c1_i32 : i32
    %90 = arith.index_cast %89 : i32 to index
    %c0_21 = arith.constant 0 : index
    %c16_22 = arith.constant 16 : index
    %91 = vector.load %arg4[%90, %c0_21, %c16_22] : memref<8x8x32xf32, #tpu.memory_space<vmem>>, vector<1x8x16xf32>
    %92 = vector.shape_cast %91 : vector<1x8x16xf32> to vector<8x16xf32>
    %93 = vector.shape_cast %88 : vector<8x16xf32> to vector<1x8x16xf32>
    tpu.vector_store %arg4[%90, %c0_21, %c16_22], %93 {strides = array<i32>} : memref<8x8x32xf32, #tpu.memory_space<vmem>>, vector<1x8x16xf32>,
    %c2_i32 = arith.constant 2 : i32
    %94 = arith.index_cast %c2_i32 : i32 to index
    %c0_23 = arith.constant 0 : index
    %c0_24 = arith.constant 0 : index
    %95 = vector.load %arg2[%94, %c0_23, %c0_24] : memref<8x8x128xbf16, #tpu.memory_space<vmem>>, vector<1x8x128xbf16>
    %96 = vector.shape_cast %95 : vector<1x8x128xbf16> to vector<8x128xbf16>
    %97 = arith.extf %96 : vector<8x128xbf16> to vector<8x128xf32>
    %98 = arith.truncf %79 : vector<8x32xf32> to vector<8x32xbf16>
    %cst_25 = arith.constant dense<0.000000e+00> : vector<8x128xf32>
    %99 = tpu.matmul %98, %0, %cst_25 {dimension_numbers = #tpu.dot_dimension_numbers<[1], [0], [0], [1], [0, 0, 1, 1], [], []>} : vector<8x32xbf16>, vector<32x128xbf16>, vector<8x128xf32> -> vector<8x128xf32>
    %100 = arith.addf %97, %99 : vector<8x128xf32>
    %101 = vector.extract_strided_slice %100 {offsets = [0, 0], sizes = [8, 96], strides = [1, 1]} : vector<8x128xf32> to vector<8x96xf32>
    %102 = arith.negf %101 : vector<8x96xf32>
    %103 = math.exp %102 : vector<8x96xf32>
    %cst_26 = arith.constant 1.000000e+00 : f32
    %104 = vector.broadcast %cst_26 : f32 to vector<8x96xf32>
    %105 = arith.addf %104, %103 : vector<8x96xf32>
    %106 = arith.divf %104, %105 : vector<8x96xf32>
    %107 = vector.extract_strided_slice %100 {offsets = [0, 96], sizes = [8, 32], strides = [1, 1]} : vector<8x128xf32> to vector<8x32xf32>
    %108 = math.tanh %107 : vector<8x32xf32>
    %109 = vector.extract_strided_slice %106 {offsets = [0, 0], sizes = [8, 32], strides = [1, 1]} : vector<8x96xf32> to vector<8x32xf32>
    %110 = vector.extract_strided_slice %106 {offsets = [0, 32], sizes = [8, 32], strides = [1, 1]} : vector<8x96xf32> to vector<8x32xf32>
    %111 = vector.extract_strided_slice %106 {offsets = [0, 64], sizes = [8, 32], strides = [1, 1]} : vector<8x96xf32> to vector<8x32xf32>
    %112 = arith.mulf %110, %80 : vector<8x32xf32>
    %113 = arith.mulf %109, %108 : vector<8x32xf32>
    %114 = arith.addf %112, %113 : vector<8x32xf32>
    %115 = math.tanh %114 : vector<8x32xf32>
    %116 = arith.mulf %111, %115 : vector<8x32xf32>
    %c7_i32_27 = arith.constant 7 : i32
    %117 = arith.subi %c7_i32_27, %c2_i32 : i32
    %118 = vector.broadcast %c2_i32 : i32 to vector<8x32xi32>
    %119 = vector.broadcast %117 : i32 to vector<8x32xi32>
    %120 = arith.select %6, %118, %119 : vector<8x32xi1>, vector<8x32xi32>
    %121 = arith.cmpi slt, %120, %3 : vector<8x32xi32>
    %122 = arith.select %121, %116, %79 : vector<8x32xi1>, vector<8x32xf32>
    %123 = arith.select %121, %114, %80 : vector<8x32xi1>, vector<8x32xf32>
    %cst_28 = arith.constant 0.000000e+00 : f32
    %124 = vector.broadcast %cst_28 : f32 to vector<8x32xf32>
    %125 = arith.select %121, %116, %124 : vector<8x32xi1>, vector<8x32xf32>
    %126 = vector.extract_strided_slice %125 {offsets = [0, 0], sizes = [8, 16], strides = [1, 1]} : vector<8x32xf32> to vector<8x16xf32>
    %127 = arith.index_cast %c2_i32 : i32 to index
    %c0_29 = arith.constant 0 : index
    %c0_30 = arith.constant 0 : index
    %128 = vector.load %arg4[%127, %c0_29, %c0_30] : memref<8x8x32xf32, #tpu.memory_space<vmem>>, vector<1x8x16xf32>
    %129 = vector.shape_cast %128 : vector<1x8x16xf32> to vector<8x16xf32>
    %130 = vector.shape_cast %126 : vector<8x16xf32> to vector<1x8x16xf32>
    tpu.vector_store %arg4[%127, %c0_29, %c0_30], %130 {strides = array<i32>} : memref<8x8x32xf32, #tpu.memory_space<vmem>>, vector<1x8x16xf32>,
    %131 = vector.extract_strided_slice %125 {offsets = [0, 16], sizes = [8, 16], strides = [1, 1]} : vector<8x32xf32> to vector<8x16xf32>
    %c7_i32_31 = arith.constant 7 : i32
    %132 = arith.subi %c7_i32_31, %c2_i32 : i32
    %133 = arith.index_cast %132 : i32 to index
    %c0_32 = arith.constant 0 : index
    %c16_33 = arith.constant 16 : index
    %134 = vector.load %arg4[%133, %c0_32, %c16_33] : memref<8x8x32xf32, #tpu.memory_space<vmem>>, vector<1x8x16xf32>
    %135 = vector.shape_cast %134 : vector<1x8x16xf32> to vector<8x16xf32>
    %136 = vector.shape_cast %131 : vector<8x16xf32> to vector<1x8x16xf32>
    tpu.vector_store %arg4[%133, %c0_32, %c16_33], %136 {strides = array<i32>} : memref<8x8x32xf32, #tpu.memory_space<vmem>>, vector<1x8x16xf32>,
    %c3_i32 = arith.constant 3 : i32
    %137 = arith.index_cast %c3_i32 : i32 to index
    %c0_34 = arith.constant 0 : index
    %c0_35 = arith.constant 0 : index
    %138 = vector.load %arg2[%137, %c0_34, %c0_35] : memref<8x8x128xbf16, #tpu.memory_space<vmem>>, vector<1x8x128xbf16>
    %139 = vector.shape_cast %138 : vector<1x8x128xbf16> to vector<8x128xbf16>
    %140 = arith.extf %139 : vector<8x128xbf16> to vector<8x128xf32>
    %141 = arith.truncf %122 : vector<8x32xf32> to vector<8x32xbf16>
    %cst_36 = arith.constant dense<0.000000e+00> : vector<8x128xf32>
    %142 = tpu.matmul %141, %0, %cst_36 {dimension_numbers = #tpu.dot_dimension_numbers<[1], [0], [0], [1], [0, 0, 1, 1], [], []>} : vector<8x32xbf16>, vector<32x128xbf16>, vector<8x128xf32> -> vector<8x128xf32>
    %143 = arith.addf %140, %142 : vector<8x128xf32>
    %144 = vector.extract_strided_slice %143 {offsets = [0, 0], sizes = [8, 96], strides = [1, 1]} : vector<8x128xf32> to vector<8x96xf32>
    %145 = arith.negf %144 : vector<8x96xf32>
    %146 = math.exp %145 : vector<8x96xf32>
    %cst_37 = arith.constant 1.000000e+00 : f32
    %147 = vector.broadcast %cst_37 : f32 to vector<8x96xf32>
    %148 = arith.addf %147, %146 : vector<8x96xf32>
    %149 = arith.divf %147, %148 : vector<8x96xf32>
    %150 = vector.extract_strided_slice %143 {offsets = [0, 96], sizes = [8, 32], strides = [1, 1]} : vector<8x128xf32> to vector<8x32xf32>
    %151 = math.tanh %150 : vector<8x32xf32>
    %152 = vector.extract_strided_slice %149 {offsets = [0, 0], sizes = [8, 32], strides = [1, 1]} : vector<8x96xf32> to vector<8x32xf32>
    %153 = vector.extract_strided_slice %149 {offsets = [0, 32], sizes = [8, 32], strides = [1, 1]} : vector<8x96xf32> to vector<8x32xf32>
    %154 = vector.extract_strided_slice %149 {offsets = [0, 64], sizes = [8, 32], strides = [1, 1]} : vector<8x96xf32> to vector<8x32xf32>
    %155 = arith.mulf %153, %123 : vector<8x32xf32>
    %156 = arith.mulf %152, %151 : vector<8x32xf32>
    %157 = arith.addf %155, %156 : vector<8x32xf32>
    %158 = math.tanh %157 : vector<8x32xf32>
    %159 = arith.mulf %154, %158 : vector<8x32xf32>
    %c7_i32_38 = arith.constant 7 : i32
    %160 = arith.subi %c7_i32_38, %c3_i32 : i32
    %161 = vector.broadcast %c3_i32 : i32 to vector<8x32xi32>
    %162 = vector.broadcast %160 : i32 to vector<8x32xi32>
    %163 = arith.select %6, %161, %162 : vector<8x32xi1>, vector<8x32xi32>
    %164 = arith.cmpi slt, %163, %3 : vector<8x32xi32>
    %165 = arith.select %164, %159, %122 : vector<8x32xi1>, vector<8x32xf32>
    %166 = arith.select %164, %157, %123 : vector<8x32xi1>, vector<8x32xf32>
    %cst_39 = arith.constant 0.000000e+00 : f32
    %167 = vector.broadcast %cst_39 : f32 to vector<8x32xf32>
    %168 = arith.select %164, %159, %167 : vector<8x32xi1>, vector<8x32xf32>
    %169 = vector.extract_strided_slice %168 {offsets = [0, 0], sizes = [8, 16], strides = [1, 1]} : vector<8x32xf32> to vector<8x16xf32>
    %170 = arith.index_cast %c3_i32 : i32 to index
    %c0_40 = arith.constant 0 : index
    %c0_41 = arith.constant 0 : index
    %171 = vector.load %arg4[%170, %c0_40, %c0_41] : memref<8x8x32xf32, #tpu.memory_space<vmem>>, vector<1x8x16xf32>
    %172 = vector.shape_cast %171 : vector<1x8x16xf32> to vector<8x16xf32>
    %173 = vector.shape_cast %169 : vector<8x16xf32> to vector<1x8x16xf32>
    tpu.vector_store %arg4[%170, %c0_40, %c0_41], %173 {strides = array<i32>} : memref<8x8x32xf32, #tpu.memory_space<vmem>>, vector<1x8x16xf32>,
    %174 = vector.extract_strided_slice %168 {offsets = [0, 16], sizes = [8, 16], strides = [1, 1]} : vector<8x32xf32> to vector<8x16xf32>
    %c7_i32_42 = arith.constant 7 : i32
    %175 = arith.subi %c7_i32_42, %c3_i32 : i32
    %176 = arith.index_cast %175 : i32 to index
    %c0_43 = arith.constant 0 : index
    %c16_44 = arith.constant 16 : index
    %177 = vector.load %arg4[%176, %c0_43, %c16_44] : memref<8x8x32xf32, #tpu.memory_space<vmem>>, vector<1x8x16xf32>
    %178 = vector.shape_cast %177 : vector<1x8x16xf32> to vector<8x16xf32>
    %179 = vector.shape_cast %174 : vector<8x16xf32> to vector<1x8x16xf32>
    tpu.vector_store %arg4[%176, %c0_43, %c16_44], %179 {strides = array<i32>} : memref<8x8x32xf32, #tpu.memory_space<vmem>>, vector<1x8x16xf32>,
    %c4_i32 = arith.constant 4 : i32
    %180 = arith.index_cast %c4_i32 : i32 to index
    %c0_45 = arith.constant 0 : index
    %c0_46 = arith.constant 0 : index
    %181 = vector.load %arg2[%180, %c0_45, %c0_46] : memref<8x8x128xbf16, #tpu.memory_space<vmem>>, vector<1x8x128xbf16>
    %182 = vector.shape_cast %181 : vector<1x8x128xbf16> to vector<8x128xbf16>
    %183 = arith.extf %182 : vector<8x128xbf16> to vector<8x128xf32>
    %184 = arith.truncf %165 : vector<8x32xf32> to vector<8x32xbf16>
    %cst_47 = arith.constant dense<0.000000e+00> : vector<8x128xf32>
    %185 = tpu.matmul %184, %0, %cst_47 {dimension_numbers = #tpu.dot_dimension_numbers<[1], [0], [0], [1], [0, 0, 1, 1], [], []>} : vector<8x32xbf16>, vector<32x128xbf16>, vector<8x128xf32> -> vector<8x128xf32>
    %186 = arith.addf %183, %185 : vector<8x128xf32>
    %187 = vector.extract_strided_slice %186 {offsets = [0, 0], sizes = [8, 96], strides = [1, 1]} : vector<8x128xf32> to vector<8x96xf32>
    %188 = arith.negf %187 : vector<8x96xf32>
    %189 = math.exp %188 : vector<8x96xf32>
    %cst_48 = arith.constant 1.000000e+00 : f32
    %190 = vector.broadcast %cst_48 : f32 to vector<8x96xf32>
    %191 = arith.addf %190, %189 : vector<8x96xf32>
    %192 = arith.divf %190, %191 : vector<8x96xf32>
    %193 = vector.extract_strided_slice %186 {offsets = [0, 96], sizes = [8, 32], strides = [1, 1]} : vector<8x128xf32> to vector<8x32xf32>
    %194 = math.tanh %193 : vector<8x32xf32>
    %195 = vector.extract_strided_slice %192 {offsets = [0, 0], sizes = [8, 32], strides = [1, 1]} : vector<8x96xf32> to vector<8x32xf32>
    %196 = vector.extract_strided_slice %192 {offsets = [0, 32], sizes = [8, 32], strides = [1, 1]} : vector<8x96xf32> to vector<8x32xf32>
    %197 = vector.extract_strided_slice %192 {offsets = [0, 64], sizes = [8, 32], strides = [1, 1]} : vector<8x96xf32> to vector<8x32xf32>
    %198 = arith.mulf %196, %166 : vector<8x32xf32>
    %199 = arith.mulf %195, %194 : vector<8x32xf32>
    %200 = arith.addf %198, %199 : vector<8x32xf32>
    %201 = math.tanh %200 : vector<8x32xf32>
    %202 = arith.mulf %197, %201 : vector<8x32xf32>
    %c7_i32_49 = arith.constant 7 : i32
    %203 = arith.subi %c7_i32_49, %c4_i32 : i32
    %204 = vector.broadcast %c4_i32 : i32 to vector<8x32xi32>
    %205 = vector.broadcast %203 : i32 to vector<8x32xi32>
    %206 = arith.select %6, %204, %205 : vector<8x32xi1>, vector<8x32xi32>
    %207 = arith.cmpi slt, %206, %3 : vector<8x32xi32>
    %208 = arith.select %207, %202, %165 : vector<8x32xi1>, vector<8x32xf32>
    %209 = arith.select %207, %200, %166 : vector<8x32xi1>, vector<8x32xf32>
    %cst_50 = arith.constant 0.000000e+00 : f32
    %210 = vector.broadcast %cst_50 : f32 to vector<8x32xf32>
    %211 = arith.select %207, %202, %210 : vector<8x32xi1>, vector<8x32xf32>
    %212 = vector.extract_strided_slice %211 {offsets = [0, 0], sizes = [8, 16], strides = [1, 1]} : vector<8x32xf32> to vector<8x16xf32>
    %213 = arith.index_cast %c4_i32 : i32 to index
    %c0_51 = arith.constant 0 : index
    %c0_52 = arith.constant 0 : index
    %214 = vector.load %arg4[%213, %c0_51, %c0_52] : memref<8x8x32xf32, #tpu.memory_space<vmem>>, vector<1x8x16xf32>
    %215 = vector.shape_cast %214 : vector<1x8x16xf32> to vector<8x16xf32>
    %216 = vector.shape_cast %212 : vector<8x16xf32> to vector<1x8x16xf32>
    tpu.vector_store %arg4[%213, %c0_51, %c0_52], %216 {strides = array<i32>} : memref<8x8x32xf32, #tpu.memory_space<vmem>>, vector<1x8x16xf32>,
    %217 = vector.extract_strided_slice %211 {offsets = [0, 16], sizes = [8, 16], strides = [1, 1]} : vector<8x32xf32> to vector<8x16xf32>
    %c7_i32_53 = arith.constant 7 : i32
    %218 = arith.subi %c7_i32_53, %c4_i32 : i32
    %219 = arith.index_cast %218 : i32 to index
    %c0_54 = arith.constant 0 : index
    %c16_55 = arith.constant 16 : index
    %220 = vector.load %arg4[%219, %c0_54, %c16_55] : memref<8x8x32xf32, #tpu.memory_space<vmem>>, vector<1x8x16xf32>
    %221 = vector.shape_cast %220 : vector<1x8x16xf32> to vector<8x16xf32>
    %222 = vector.shape_cast %217 : vector<8x16xf32> to vector<1x8x16xf32>
    tpu.vector_store %arg4[%219, %c0_54, %c16_55], %222 {strides = array<i32>} : memref<8x8x32xf32, #tpu.memory_space<vmem>>, vector<1x8x16xf32>,
    %c5_i32 = arith.constant 5 : i32
    %223 = arith.index_cast %c5_i32 : i32 to index
    %c0_56 = arith.constant 0 : index
    %c0_57 = arith.constant 0 : index
    %224 = vector.load %arg2[%223, %c0_56, %c0_57] : memref<8x8x128xbf16, #tpu.memory_space<vmem>>, vector<1x8x128xbf16>
    %225 = vector.shape_cast %224 : vector<1x8x128xbf16> to vector<8x128xbf16>
    %226 = arith.extf %225 : vector<8x128xbf16> to vector<8x128xf32>
    %227 = arith.truncf %208 : vector<8x32xf32> to vector<8x32xbf16>
    %cst_58 = arith.constant dense<0.000000e+00> : vector<8x128xf32>
    %228 = tpu.matmul %227, %0, %cst_58 {dimension_numbers = #tpu.dot_dimension_numbers<[1], [0], [0], [1], [0, 0, 1, 1], [], []>} : vector<8x32xbf16>, vector<32x128xbf16>, vector<8x128xf32> -> vector<8x128xf32>
    %229 = arith.addf %226, %228 : vector<8x128xf32>
    %230 = vector.extract_strided_slice %229 {offsets = [0, 0], sizes = [8, 96], strides = [1, 1]} : vector<8x128xf32> to vector<8x96xf32>
    %231 = arith.negf %230 : vector<8x96xf32>
    %232 = math.exp %231 : vector<8x96xf32>
    %cst_59 = arith.constant 1.000000e+00 : f32
    %233 = vector.broadcast %cst_59 : f32 to vector<8x96xf32>
    %234 = arith.addf %233, %232 : vector<8x96xf32>
    %235 = arith.divf %233, %234 : vector<8x96xf32>
    %236 = vector.extract_strided_slice %229 {offsets = [0, 96], sizes = [8, 32], strides = [1, 1]} : vector<8x128xf32> to vector<8x32xf32>
    %237 = math.tanh %236 : vector<8x32xf32>
    %238 = vector.extract_strided_slice %235 {offsets = [0, 0], sizes = [8, 32], strides = [1, 1]} : vector<8x96xf32> to vector<8x32xf32>
    %239 = vector.extract_strided_slice %235 {offsets = [0, 32], sizes = [8, 32], strides = [1, 1]} : vector<8x96xf32> to vector<8x32xf32>
    %240 = vector.extract_strided_slice %235 {offsets = [0, 64], sizes = [8, 32], strides = [1, 1]} : vector<8x96xf32> to vector<8x32xf32>
    %241 = arith.mulf %239, %209 : vector<8x32xf32>
    %242 = arith.mulf %238, %237 : vector<8x32xf32>
    %243 = arith.addf %241, %242 : vector<8x32xf32>
    %244 = math.tanh %243 : vector<8x32xf32>
    %245 = arith.mulf %240, %244 : vector<8x32xf32>
    %c7_i32_60 = arith.constant 7 : i32
    %246 = arith.subi %c7_i32_60, %c5_i32 : i32
    %247 = vector.broadcast %c5_i32 : i32 to vector<8x32xi32>
    %248 = vector.broadcast %246 : i32 to vector<8x32xi32>
    %249 = arith.select %6, %247, %248 : vector<8x32xi1>, vector<8x32xi32>
    %250 = arith.cmpi slt, %249, %3 : vector<8x32xi32>
    %251 = arith.select %250, %245, %208 : vector<8x32xi1>, vector<8x32xf32>
    %252 = arith.select %250, %243, %209 : vector<8x32xi1>, vector<8x32xf32>
    %cst_61 = arith.constant 0.000000e+00 : f32
    %253 = vector.broadcast %cst_61 : f32 to vector<8x32xf32>
    %254 = arith.select %250, %245, %253 : vector<8x32xi1>, vector<8x32xf32>
    %255 = vector.extract_strided_slice %254 {offsets = [0, 0], sizes = [8, 16], strides = [1, 1]} : vector<8x32xf32> to vector<8x16xf32>
    %256 = arith.index_cast %c5_i32 : i32 to index
    %c0_62 = arith.constant 0 : index
    %c0_63 = arith.constant 0 : index
    %257 = vector.load %arg4[%256, %c0_62, %c0_63] : memref<8x8x32xf32, #tpu.memory_space<vmem>>, vector<1x8x16xf32>
    %258 = vector.shape_cast %257 : vector<1x8x16xf32> to vector<8x16xf32>
    %259 = vector.shape_cast %255 : vector<8x16xf32> to vector<1x8x16xf32>
    tpu.vector_store %arg4[%256, %c0_62, %c0_63], %259 {strides = array<i32>} : memref<8x8x32xf32, #tpu.memory_space<vmem>>, vector<1x8x16xf32>,
    %260 = vector.extract_strided_slice %254 {offsets = [0, 16], sizes = [8, 16], strides = [1, 1]} : vector<8x32xf32> to vector<8x16xf32>
    %c7_i32_64 = arith.constant 7 : i32
    %261 = arith.subi %c7_i32_64, %c5_i32 : i32
    %262 = arith.index_cast %261 : i32 to index
    %c0_65 = arith.constant 0 : index
    %c16_66 = arith.constant 16 : index
    %263 = vector.load %arg4[%262, %c0_65, %c16_66] : memref<8x8x32xf32, #tpu.memory_space<vmem>>, vector<1x8x16xf32>
    %264 = vector.shape_cast %263 : vector<1x8x16xf32> to vector<8x16xf32>
    %265 = vector.shape_cast %260 : vector<8x16xf32> to vector<1x8x16xf32>
    tpu.vector_store %arg4[%262, %c0_65, %c16_66], %265 {strides = array<i32>} : memref<8x8x32xf32, #tpu.memory_space<vmem>>, vector<1x8x16xf32>,
    %c6_i32 = arith.constant 6 : i32
    %266 = arith.index_cast %c6_i32 : i32 to index
    %c0_67 = arith.constant 0 : index
    %c0_68 = arith.constant 0 : index
    %267 = vector.load %arg2[%266, %c0_67, %c0_68] : memref<8x8x128xbf16, #tpu.memory_space<vmem>>, vector<1x8x128xbf16>
    %268 = vector.shape_cast %267 : vector<1x8x128xbf16> to vector<8x128xbf16>
    %269 = arith.extf %268 : vector<8x128xbf16> to vector<8x128xf32>
    %270 = arith.truncf %251 : vector<8x32xf32> to vector<8x32xbf16>
    %cst_69 = arith.constant dense<0.000000e+00> : vector<8x128xf32>
    %271 = tpu.matmul %270, %0, %cst_69 {dimension_numbers = #tpu.dot_dimension_numbers<[1], [0], [0], [1], [0, 0, 1, 1], [], []>} : vector<8x32xbf16>, vector<32x128xbf16>, vector<8x128xf32> -> vector<8x128xf32>
    %272 = arith.addf %269, %271 : vector<8x128xf32>
    %273 = vector.extract_strided_slice %272 {offsets = [0, 0], sizes = [8, 96], strides = [1, 1]} : vector<8x128xf32> to vector<8x96xf32>
    %274 = arith.negf %273 : vector<8x96xf32>
    %275 = math.exp %274 : vector<8x96xf32>
    %cst_70 = arith.constant 1.000000e+00 : f32
    %276 = vector.broadcast %cst_70 : f32 to vector<8x96xf32>
    %277 = arith.addf %276, %275 : vector<8x96xf32>
    %278 = arith.divf %276, %277 : vector<8x96xf32>
    %279 = vector.extract_strided_slice %272 {offsets = [0, 96], sizes = [8, 32], strides = [1, 1]} : vector<8x128xf32> to vector<8x32xf32>
    %280 = math.tanh %279 : vector<8x32xf32>
    %281 = vector.extract_strided_slice %278 {offsets = [0, 0], sizes = [8, 32], strides = [1, 1]} : vector<8x96xf32> to vector<8x32xf32>
    %282 = vector.extract_strided_slice %278 {offsets = [0, 32], sizes = [8, 32], strides = [1, 1]} : vector<8x96xf32> to vector<8x32xf32>
    %283 = vector.extract_strided_slice %278 {offsets = [0, 64], sizes = [8, 32], strides = [1, 1]} : vector<8x96xf32> to vector<8x32xf32>
    %284 = arith.mulf %282, %252 : vector<8x32xf32>
    %285 = arith.mulf %281, %280 : vector<8x32xf32>
    %286 = arith.addf %284, %285 : vector<8x32xf32>
    %287 = math.tanh %286 : vector<8x32xf32>
    %288 = arith.mulf %283, %287 : vector<8x32xf32>
    %c7_i32_71 = arith.constant 7 : i32
    %289 = arith.subi %c7_i32_71, %c6_i32 : i32
    %290 = vector.broadcast %c6_i32 : i32 to vector<8x32xi32>
    %291 = vector.broadcast %289 : i32 to vector<8x32xi32>
    %292 = arith.select %6, %290, %291 : vector<8x32xi1>, vector<8x32xi32>
    %293 = arith.cmpi slt, %292, %3 : vector<8x32xi32>
    %294 = arith.select %293, %288, %251 : vector<8x32xi1>, vector<8x32xf32>
    %295 = arith.select %293, %286, %252 : vector<8x32xi1>, vector<8x32xf32>
    %cst_72 = arith.constant 0.000000e+00 : f32
    %296 = vector.broadcast %cst_72 : f32 to vector<8x32xf32>
    %297 = arith.select %293, %288, %296 : vector<8x32xi1>, vector<8x32xf32>
    %298 = vector.extract_strided_slice %297 {offsets = [0, 0], sizes = [8, 16], strides = [1, 1]} : vector<8x32xf32> to vector<8x16xf32>
    %299 = arith.index_cast %c6_i32 : i32 to index
    %c0_73 = arith.constant 0 : index
    %c0_74 = arith.constant 0 : index
    %300 = vector.load %arg4[%299, %c0_73, %c0_74] : memref<8x8x32xf32, #tpu.memory_space<vmem>>, vector<1x8x16xf32>
    %301 = vector.shape_cast %300 : vector<1x8x16xf32> to vector<8x16xf32>
    %302 = vector.shape_cast %298 : vector<8x16xf32> to vector<1x8x16xf32>
    tpu.vector_store %arg4[%299, %c0_73, %c0_74], %302 {strides = array<i32>} : memref<8x8x32xf32, #tpu.memory_space<vmem>>, vector<1x8x16xf32>,
    %303 = vector.extract_strided_slice %297 {offsets = [0, 16], sizes = [8, 16], strides = [1, 1]} : vector<8x32xf32> to vector<8x16xf32>
    %c7_i32_75 = arith.constant 7 : i32
    %304 = arith.subi %c7_i32_75, %c6_i32 : i32
    %305 = arith.index_cast %304 : i32 to index
    %c0_76 = arith.constant 0 : index
    %c16_77 = arith.constant 16 : index
    %306 = vector.load %arg4[%305, %c0_76, %c16_77] : memref<8x8x32xf32, #tpu.memory_space<vmem>>, vector<1x8x16xf32>
    %307 = vector.shape_cast %306 : vector<1x8x16xf32> to vector<8x16xf32>
    %308 = vector.shape_cast %303 : vector<8x16xf32> to vector<1x8x16xf32>
    tpu.vector_store %arg4[%305, %c0_76, %c16_77], %308 {strides = array<i32>} : memref<8x8x32xf32, #tpu.memory_space<vmem>>, vector<1x8x16xf32>,
    %c7_i32_78 = arith.constant 7 : i32
    %309 = arith.index_cast %c7_i32_78 : i32 to index
    %c0_79 = arith.constant 0 : index
    %c0_80 = arith.constant 0 : index
    %310 = vector.load %arg2[%309, %c0_79, %c0_80] : memref<8x8x128xbf16, #tpu.memory_space<vmem>>, vector<1x8x128xbf16>
    %311 = vector.shape_cast %310 : vector<1x8x128xbf16> to vector<8x128xbf16>
    %312 = arith.extf %311 : vector<8x128xbf16> to vector<8x128xf32>
    %313 = arith.truncf %294 : vector<8x32xf32> to vector<8x32xbf16>
    %cst_81 = arith.constant dense<0.000000e+00> : vector<8x128xf32>
    %314 = tpu.matmul %313, %0, %cst_81 {dimension_numbers = #tpu.dot_dimension_numbers<[1], [0], [0], [1], [0, 0, 1, 1], [], []>} : vector<8x32xbf16>, vector<32x128xbf16>, vector<8x128xf32> -> vector<8x128xf32>
    %315 = arith.addf %312, %314 : vector<8x128xf32>
    %316 = vector.extract_strided_slice %315 {offsets = [0, 0], sizes = [8, 96], strides = [1, 1]} : vector<8x128xf32> to vector<8x96xf32>
    %317 = arith.negf %316 : vector<8x96xf32>
    %318 = math.exp %317 : vector<8x96xf32>
    %cst_82 = arith.constant 1.000000e+00 : f32
    %319 = vector.broadcast %cst_82 : f32 to vector<8x96xf32>
    %320 = arith.addf %319, %318 : vector<8x96xf32>
    %321 = arith.divf %319, %320 : vector<8x96xf32>
    %322 = vector.extract_strided_slice %315 {offsets = [0, 96], sizes = [8, 32], strides = [1, 1]} : vector<8x128xf32> to vector<8x32xf32>
    %323 = math.tanh %322 : vector<8x32xf32>
    %324 = vector.extract_strided_slice %321 {offsets = [0, 0], sizes = [8, 32], strides = [1, 1]} : vector<8x96xf32> to vector<8x32xf32>
    %325 = vector.extract_strided_slice %321 {offsets = [0, 32], sizes = [8, 32], strides = [1, 1]} : vector<8x96xf32> to vector<8x32xf32>
    %326 = vector.extract_strided_slice %321 {offsets = [0, 64], sizes = [8, 32], strides = [1, 1]} : vector<8x96xf32> to vector<8x32xf32>
    %327 = arith.mulf %325, %295 : vector<8x32xf32>
    %328 = arith.mulf %324, %323 : vector<8x32xf32>
    %329 = arith.addf %327, %328 : vector<8x32xf32>
    %330 = math.tanh %329 : vector<8x32xf32>
    %331 = arith.mulf %326, %330 : vector<8x32xf32>
    %c7_i32_83 = arith.constant 7 : i32
    %332 = arith.subi %c7_i32_83, %c7_i32_78 : i32
    %333 = vector.broadcast %c7_i32_78 : i32 to vector<8x32xi32>
    %334 = vector.broadcast %332 : i32 to vector<8x32xi32>
    %335 = arith.select %6, %333, %334 : vector<8x32xi1>, vector<8x32xi32>
    %336 = arith.cmpi slt, %335, %3 : vector<8x32xi32>
    %337 = arith.select %336, %331, %294 : vector<8x32xi1>, vector<8x32xf32>
    %338 = arith.select %336, %329, %295 : vector<8x32xi1>, vector<8x32xf32>
    %cst_84 = arith.constant 0.000000e+00 : f32
    %339 = vector.broadcast %cst_84 : f32 to vector<8x32xf32>
    %340 = arith.select %336, %331, %339 : vector<8x32xi1>, vector<8x32xf32>
    %341 = vector.extract_strided_slice %340 {offsets = [0, 0], sizes = [8, 16], strides = [1, 1]} : vector<8x32xf32> to vector<8x16xf32>
    %342 = arith.index_cast %c7_i32_78 : i32 to index
    %c0_85 = arith.constant 0 : index
    %c0_86 = arith.constant 0 : index
    %343 = vector.load %arg4[%342, %c0_85, %c0_86] : memref<8x8x32xf32, #tpu.memory_space<vmem>>, vector<1x8x16xf32>
    %344 = vector.shape_cast %343 : vector<1x8x16xf32> to vector<8x16xf32>
    %345 = vector.shape_cast %341 : vector<8x16xf32> to vector<1x8x16xf32>
    tpu.vector_store %arg4[%342, %c0_85, %c0_86], %345 {strides = array<i32>} : memref<8x8x32xf32, #tpu.memory_space<vmem>>, vector<1x8x16xf32>,
    %346 = vector.extract_strided_slice %340 {offsets = [0, 16], sizes = [8, 16], strides = [1, 1]} : vector<8x32xf32> to vector<8x16xf32>
    %c7_i32_87 = arith.constant 7 : i32
    %347 = arith.subi %c7_i32_87, %c7_i32_78 : i32
    %348 = arith.index_cast %347 : i32 to index
    %c0_88 = arith.constant 0 : index
    %c16_89 = arith.constant 16 : index
    %349 = vector.load %arg4[%348, %c0_88, %c16_89] : memref<8x8x32xf32, #tpu.memory_space<vmem>>, vector<1x8x16xf32>
    %350 = vector.shape_cast %349 : vector<1x8x16xf32> to vector<8x16xf32>
    %351 = vector.shape_cast %346 : vector<8x16xf32> to vector<1x8x16xf32>
    tpu.vector_store %arg4[%348, %c0_88, %c16_89], %351 {strides = array<i32>} : memref<8x8x32xf32, #tpu.memory_space<vmem>>, vector<1x8x16xf32>,
    %c8_i32 = arith.constant 8 : i32
    return
  }
  func.func @transform_0(%arg0: i32) -> (i32, i32) {
    %c0_i32 = arith.constant 0 : i32
    %c0_i32_0 = arith.constant 0 : i32
    return %arg0, %c0_i32 : i32, i32
  }
  func.func @transform_1(%arg0: i32) -> (i32, i32, i32) {
    %c0_i32 = arith.constant 0 : i32
    %c0_i32_0 = arith.constant 0 : i32
    %c0_i32_1 = arith.constant 0 : i32
    return %c0_i32, %arg0, %c0_i32_0 : i32, i32, i32
  }
  func.func @transform_2(%arg0: i32) -> (i32, i32) {
    %c0_i32 = arith.constant 0 : i32
    %c0_i32_0 = arith.constant 0 : i32
    %c0_i32_1 = arith.constant 0 : i32
    return %c0_i32, %c0_i32_0 : i32, i32
  }
  func.func @transform_3(%arg0: i32) -> (i32, i32, i32) {
    %c0_i32 = arith.constant 0 : i32
    %c0_i32_0 = arith.constant 0 : i32
    %c0_i32_1 = arith.constant 0 : i32
    return %c0_i32, %arg0, %c0_i32_0 : i32, i32, i32
  }
}

</mosaic_0001>

<bundles_post_ra>
// kernel: tpu_custom_call.1
= control target key start
LH: loop header
LB: loop body
LE: loop exit
PB: predicated region body
PF: predicated region fallthrough
CT: control target
= control target key end

     0   :  { %8 = vsyncpa [#allocation3], 0  ;;  %s1822_s0 = inlined_call_operand.vmem [shape: s32[16,1], index: 0, kind: input, shape index: {}]   ;;  %s1823_s1 = inlined_call_operand.hbm [shape: bf16[8,16,128], index: 1, kind: input, shape index: {}]   ;;  %s1824_s2 = inlined_call_operand.vmem [shape: bf16[32,128], index: 2, kind: input, shape index: {}]   ;;  %s1825_s3 = inlined_call_operand.hbm [shape: f32[8,16,32], index: 3, kind: output, shape index: {}]  }
   0x1   :  { %10 = vsyncpa [#allocation3 + $0x1], 0 }
   0x2   :  { %11 = vsyncpa [#allocation4], 0 }
   0x3   :  { %13 = vsyncpa [#allocation4 + $0x1], 0  ;;  %s1463_s12 = smov 0   ;;  %s1465_s13 = smov 0  }
   0x4   :  { %s1467_s14 = smov 0   ;;  %s1469_s15 = smov 0  }
   0x5 LB: > { %s1484_s16 = sadd.s32 4294967295, %s1420_s15   ;;  %s1052_s17 = sadd.s32 4294967294, %s1420_s15   ;;  %s1420_s15 = sphi %s1469_s15, %s1839_s15   ;;  %s1416_s14 = sphi %s1467_s14, %s1838_s14   ;;  %s1412_s13 = sphi %s1465_s13, %s1837_s13   ;;  %s1408_s12 = sphi %s1463_s12, %s1836_s12  }
   0x6   : > { %s1488_s18 = sadd.s32 1, %s1420_s15   ;;  %s52_s19 = sadd.s32 1, %s1416_s14 }
   0x7   : > { %s49_s20 = ssub.s32 %s1420_s15, %s1488_s18  ;;  %p59_p0 = scmp.ne.s32.totalorder %s1416_s14, %s1412_s13 }
   0x8   : > { %p50_p1 = scmp.eq.s32.totalorder %s49_s20, 0  ;;  %p60_p2 = scmp.eq.s32.totalorder %s1420_s15, 0 }
   0x9   : > { %p65_p3 = scmp.ne.s32.totalorder %s1412_s13, %s1408_s12  ;;  %p66_p4 = scmp.eq.s32.totalorder %s1484_s16, 0 }
   0xa   : > { %s1500_s21 = scalar_select %p50_p1, %s1416_s14, %s52_s19  }
   0xb   : > { %p1502_p5 = por %p60_p2, %p59_p0  ;;  %p1506_p6 = por %p66_p4, %p65_p3 }
   0xc   : > { %p110_p7 = scmp.eq.s32.totalorder %s1484_s16, 1  ;;  %p116_p8 = scmp.eq.s32.totalorder %s1052_s17, 1 }
   0xd   : > { %p1203_p10 = scmp.lt.s32.totalorder %s1420_s15, 2  ;;  %s146_s26 = sand.u32 1, %s1416_s14  }
   0xe   : > { %p1513_p11 = por %p110_p7, %p59_p0  ;;  %p1517_p12 = por %p116_p8, %p65_p3 }
   0xf   : > { %s1056_s27 = sshll.u32 %s1420_s15, 6  ;;  %s1055_s28 = sshll.u32 %s146_s26, 5 }
  0x10   : > { %s1829_s24 = scalar_select %p1513_p11, 1, 0 }
  0x11   : > { %s1830_s25 = scalar_select %p1517_p12, 1, 0 }
  0x12   : > { %s1526_s4 = scalar_lea.hbm %s1823_s1, %s1056_s27  ;;  %s150_s5 = scalar_lea.vmem [#allocation2], %s1055_s28 }
  0x13   : > { %s156_s6 = sshll.u32 %s150_s5, 4  ;;  %p1530_p13 = pnand %p1203_p10, %p1502_p5  ;;  %s1534_s6 = int_to_ptr.vmem [resolvable:$true] %s156_s6 }
  0x14   : > { %s1537_s8 = scalar_lea.sflag [#allocation3], %s146_s26  ;;  %s1324_s9 = scalar_lea.hbm %s1526_s4, 512 }
  0x15   : > { %p1325_p1 = scmp.ne.s32.totalorder %s1526_s4, %s1324_s9  ;;  %p1326_p2 = pneg %p1530_p13 }
  0x16   : > { %s1329_s17 = scalar_lea.hbm %s1823_s1, 1024  ;;  %p1330_p5 = scmp.lt.u32.totalorder %s1526_s4, %s1823_s1 }
  0x17   : > { %p1327_p3 = pnand %p1326_p2, %p1325_p1  ;;  %p1331_p7 = scmp.lt.u32.totalorder %s1329_s17, %s1324_s9 }
  0x18   : > { %p1333_p10 = scmp.lt.u32.totalorder %s1324_s9, %s1526_s4 }
  0x19   : > { %p1328_p4 = pneg %p1327_p3  ;;  %p1332_p8 = por %p1331_p7, %p1330_p5 }
  0x1b   : > { %p1334_p9 = por %p1333_p10, %p1332_p8 }
  0x1d   : > { %p1335_p0 = pnand %p1334_p9, %p1328_p4 }
  0x1f   : > { %1338 = shalt.err (!%p1335_p0)
}
  0x20   : > { %s1339_s22 = scalar_lea.vmem %s1534_s6, 512  ;;  %s1422_s26 = smov [#allocation2]  }
  0x21   : > { %p1340_p1 = scmp.ne.s32.totalorder %s1534_s6, %s1339_s22  ;;  %s1344_s27 = sshll.u32 %s1422_s26, 4  ;;  %s1345_s27 = int_to_ptr.vmem [resolvable:$false] %s1344_s27 }
  0x22   : > { %s1346_s28 = scalar_lea.vmem %s1345_s27, 1024  ;;  %p1347_p11 = scmp.lt.s32.totalorder %s1534_s6, %s1345_s27 }
  0x23   : > { %p1342_p3 = pnand %p1340_p1, %p1326_p2  ;;  %p1348_p5 = scmp.lt.s32.totalorder %s1346_s28, %s1339_s22 }
  0x25   : > { %p1343_p12 = pneg %p1342_p3  ;;  %p1349_p7 = por %p1348_p5, %p1347_p11 }
  0x27   : > { %p1350_p8 = pnand %p1349_p7, %p1343_p12 }
  0x29   : > { %1353 = shalt.err (!%p1350_p8)
}
  0x2a   : > { %s1423_s29 = smov 128   ;;  %s1424_s30 = smov 64  }
  0x2b   : > { %s1425_s5 = smov 4   ;;  %p164_p9 = scmp.lt.s32.totalorder %s1420_s15, 3 }
  0x2c   : > { %1198 = dma.hbm_to_vmem [thread:$0]  (!%p1530_p13), %s1526_s4, 512, %s1534_s6, %s1537_s8, %s1423_s29, %s1424_s30, %s1425_s5  }
  0x2d   : > { %p1832_p0 = scmp.ge.s32.totalorder %s1420_s15, 1 }
  0x2f   : > { %p165_p2 = pnand %p1832_p0, %p164_p9 }
  0x30   : > { %s1569_s9 = sand.u32 (!%p165_p2), 1, %s1412_s13  }
  0x31   : > { %168 = sbr.rel (%p165_p2) target bundleno = 5723 (0x165b), region = 32  ;;  %s1058_s10 = sshll.u32 (!%p165_p2), %s1569_s9, 5 }
  0x32   : > { %s171_s11 = scalar_lea.sflag (!%p165_p2), [#allocation3], %s1569_s9  ;;  %s1573_s17 = scalar_lea.vmem (!%p165_p2), [#allocation2], %s1058_s10 }
  0x38   : > { %1399 = dma.done.wait (%p1506_p6), %s171_s11, 512  }
  0x39   : > { %1401 = vsyncadd (%p1506_p6), %s171_s11, 4294966784  ;;  %v1426_v0 = vmov 0.0   ;;  %vm1427_vm0 = vmmov 0   ;;  %v1428_v1 = vmov 0   ;;  %v1590_v2 = vld [vmem:[%s1824_s2] sm:$0xff]   ;;  %v1596_v3 = vld [vmem:[%s1824_s2 + $0x8] sm:$0xff]   ;;  %v214_v25 = vlaneseq }
  0x3a   : > { %1127 = vmatprep.subr.bf16.mxu0 %v1426_v0  ;;  %1131 = vmatprep.mubr.msk.bf16.mxu0 %vm1427_vm0, %v1426_v0  ;;  %v1613_v4 = vld [vmem:[%s1573_s17] sm:$0xff]   ;;  %s1429_s8 = smov 32   ;;  %p201_p6 = scmp.lt.s32.totalorder %s1484_s16, 1  ;;  %v1432_v27 = vmov 7   ;;  %vm312_vm3 = vcmask 130048   ;;  %vm315_vm4 = vcmask 261248  }
  0x3b   : > { %1256 = vset.pattern.permute.xlu1 %v1428_v1  ;;  %1135 = vmatprep.subr.bf16.mxu1 %v1426_v0  ;;  %v218_v5 = vunpack.c.l.bf16 %v1613_v4  ;;  %s1430_s28 = smov 96   ;;  %s1431_s29 = smov 64   ;;  %v1626_v26 = vand.u32 127, %v214_v25  ;;  %vm231_vm5 = vcmask 261120   ;;  %v319_v35 = vunpack.c.h.bf16 %v1613_v4  ;;  %v1070_v63 = vld [vmem:[%s1573_s17 + $0x8] sm:$0xff]  }
  0x3c   : > { %1139 = vmatprep.mubr.msk.bf16.mxu1 %vm1427_vm0, %v1426_v0  ;;  %1257 = vset.pattern.permute.xlu0 %v1428_v1  ;;  %s202_s19 = scalar_select %p201_p6, %s1484_s16, 1  ;;  %v1433_v55 = vmov 6   ;;  %v412_v4 = vunpack.c.l.bf16 %v1070_v63 }
  0x3d   : > { %1128 = vmatpush3.bf16.msra.mxu0 %v1590_v2  ;;  %1136 = vmatpush3.bf16.msra.mxu1 %v1590_v2  ;;  %vm216_vm1 = vcmp.lt.s32.totalorder %v1626_v26, 16  ;;  %s1059_s30 = sshll.u32 %s1569_s9, 6  ;;  %s1100_s10 = sshll.u32 %s1484_s16, 7 }
  0x3e   : > { %1129 = vmatprep.subr.bf16.mxu0 %v1426_v0  ;;  %1137 = vmatprep.subr.bf16.mxu1 %v1426_v0  ;;  %s1060_s20 = sshll.u32 %s202_s19, 3  ;;  %v300_v28 = vsel %vm216_vm1, 0, %v1432_v27  ;;  %s1636_s5 = scalar_lea.vmem [#allocation5], %s1059_s30  ;;  %v393_v56 = vsel %vm216_vm1, 1, %v1433_v55 }
  0x3f   : > { %s204_s27 = scalar_lea.vmem %s1822_s0, %s1060_s20  ;;  %s967_s11 = sshll.u32 %s1636_s5, 4  ;;  %s1773_s11 = int_to_ptr.vmem [resolvable:$true] %s967_s11 }
  0x40   : > { %v210_v22 = vld [vmem:[%s204_s27] sm:$0xff]  ;;  %s1771_s23 = scalar_lea.hbm %s1825_s3, %s1100_s10  ;;  %s955_s16 = scalar_lea.sflag [#allocation4], %s1569_s9 }
  0x41   : > { %1130 = vmatpush3.bf16.msra.mxu0 %v1596_v3  ;;  %1138 = vmatpush3.bf16.msra.mxu1 %v1596_v3  ;;  %s1354_s6 = scalar_lea.vmem %s1773_s11, 1024  ;;  %p1833_p12 = scmp.ne.s32.totalorder %s1829_s24, 0 }
  0x42   : > { %1143 = vmatprep.subr.bf16.mxu0 %v1426_v0  ;;  %1151 = vmatprep.subr.bf16.mxu1 %v1426_v0  ;;  %p1355_p11 = scmp.ne.s32.totalorder %s1773_s11, %s1354_s6  ;;  %s1439_s7 = smov [#allocation5]  }
  0x44   : > { %1132 = vmatmul.mubr.bf16.vlgmr.msra.gmra.mrb[0].mxu0 %v1428_v1  ;;  %p1356_p13 = pnand %p1355_p11, %p1833_p12 }
  0x45   : > { %1144 = vmatpush3.bf16.msra.mxu0 %v1590_v2  ;;  %1147 = vmatprep.mubr.msk.bf16.mxu0 %vm1427_vm0, %v1426_v0 }
  0x46   : > { %1145 = vmatprep.subr.bf16.mxu0 %v1426_v0  ;;  %p1357_p4 = pneg %p1356_p13 }
  0x49   : > { %1146 = vmatpush3.bf16.msra.mxu0 %v1596_v3 }
  0x4a   : > { %1159 = vmatprep.subr.bf16.mxu0 %v1426_v0 }
 0x117   : > { %v269_v6 = vpop.f32.mrb[0].mxu0 }
 0x118   : > { %v275_v7 = vadd.f32 %v269_v6, %v218_v5  ;;  %v1133_v8 = vpop.f32.mrb[1].mxu0 }
 0x119   : > { %v272_v9 = vpop.f32.mrb[2].mxu0 }
 0x11a   : > { %1260 = vtanh.f32 %v275_v7  ;;  %v1134_v10 = vpop.f32.mrb[3].mxu0  ;;  %v1063_v12 = vmul.f32 -1.442695, %v275_v7 }
 0x11c   : > { %1262 = vpow2.f32 %v1063_v12 }
 0x124   : > { %v1261_v11 = vpop.eup %1260 }
 0x125   : > { %285 = vrot.lane.b32.xlu0 %v1261_v11, %s1429_s8 }
 0x126   : > { %v1263_v13 = vpop.eup %1262 }
 0x127   : > { %v279_v14 = vadd.f32 1.0, %v1263_v13 }
 0x129   : > { %1264 = vrcp.f32 %v279_v14 }
 0x133   : > { %v1265_v15 = vpop.eup %1264 }
 0x134   : > { %v283_v18 = vmul.f32 0.0, %v1265_v15 }
 0x197   : > { %v286_v16 = vpop.permute.xlu0 %285 }
 0x198   : > { %v288_v17 = vmul.f32 %v1265_v15, %v286_v16 }
 0x19a   : > { %290 = vrot.lane.b32.xlu0 %v288_v17, %s1429_s8 }
 0x20c   : > { %v291_v19 = vpop.permute.xlu0 %290 }
 0x20d   : > { %v293_v20 = vadd.f32 %v291_v19, %v283_v18 }
 0x20f   : > { %1266 = vtanh.f32 %v293_v20 }
 0x219   : > { %v1267_v21 = vpop.eup %1266 }
 0x21a   : > { %296 = vrot.lane.b32.xlu1 %v1267_v21, %s1429_s8 }
 0x21e   : > { %212 = vperm.xlu1 %1256, %v210_v22  }
 0x222   : > { %308 = vrot.lane.b32.xlu1 %v293_v20, %s1430_s28 }
 0x28c   : > { %v297_v23 = vpop.permute.xlu1 %296 }
 0x28d   : > { %v299_v24 = vmul.f32 %v1265_v15, %v297_v23 }
 0x28f   : > { %303 = vrot.lane.b32.xlu0 %v299_v24, %s1431_s29  ;;  %v1434_v24 = vmov 5  }
 0x290   : > { %v486_v25 = vsel %vm216_vm1, 2, %v1434_v24 }
 0x29d   : > { %v1631_v29 = vpop.permute.xlu1 %212 }
 0x29e   : > { %vm301_vm2 = vcmp.lt.s32.totalorder %v300_v28, %v1631_v29  ;;  %vm394_vm6 = vcmp.lt.s32.totalorder %v393_v56, %v1631_v29  ;;  %vm487_vm7 = vcmp.lt.s32.totalorder %v486_v25, %v1631_v29 }
 0x2a1   : > { %v309_v30 = vpop.permute.xlu1 %308 }
 0x2a2   : > { %v311_v31 = vsel %vm301_vm2, %v309_v30, 0.0 }
 0x2a3   : > { %373 = vrot.lane.b32.xlu1 %v311_v31, %s1429_s8 }
 0x301   : > { %v304_v32 = vpop.permute.xlu0 %303 }
 0x302   : > { %v306_v33 = vsel %vm301_vm2, %v304_v32, 0.0 }
 0x303   : > { %313 = vst.msk [vmem:[%s1636_s5] sm:$0xff] %vm312_vm3, %v306_v33  ;;  %v320_v34 = vpack.c.bf16 %v306_v33, %v306_v33 }
 0x304   : > { %1064 = vst.msk [vmem:[%s1636_s5 + $0x38] sm:$0xff] %vm315_vm4, %v306_v33 }
 0x305   : > { %1140 = vmatmul.mubr.msk.bf16.vlgmr.msra.gmra.mrb[0].mxu1 %vm231_vm5, %v320_v34  ;;  %v505_v34 = vunpack.c.h.bf16 %v1070_v63 }
 0x306   : > { %1152 = vmatpush3.bf16.msra.mxu1 %v1590_v2  ;;  %1155 = vmatprep.mubr.msk.bf16.mxu1 %vm1427_vm0, %v1426_v0 }
 0x307   : > { %1153 = vmatprep.subr.bf16.mxu1 %v1426_v0 }
 0x30a   : > { %1154 = vmatpush3.bf16.msra.mxu1 %v1596_v3 }
 0x30b   : > { %1167 = vmatprep.subr.bf16.mxu1 %v1426_v0 }
 0x315   : > { %v374_v48 = vpop.permute.xlu1 %373 }
 0x3d8   : > { %v358_v36 = vpop.f32.mrb[0].mxu1 }
 0x3d9   : > { %v364_v37 = vadd.f32 %v358_v36, %v319_v35  ;;  %v1141_v38 = vpop.f32.mrb[1].mxu1 }
 0x3da   : > { %v361_v39 = vpop.f32.mrb[2].mxu1 }
 0x3db   : > { %1268 = vtanh.f32 %v364_v37  ;;  %v1142_v40 = vpop.f32.mrb[3].mxu1  ;;  %v1067_v42 = vmul.f32 -1.442695, %v364_v37 }
 0x3dd   : > { %1270 = vpow2.f32 %v1067_v42 }
 0x3e5   : > { %v1269_v41 = vpop.eup %1268 }
 0x3e6   : > { %378 = vrot.lane.b32.xlu0 %v1269_v41, %s1429_s8 }
 0x3e7   : > { %v1271_v43 = vpop.eup %1270 }
 0x3e8   : > { %v368_v44 = vadd.f32 1.0, %v1271_v43 }
 0x3ea   : > { %1272 = vrcp.f32 %v368_v44 }
 0x3f4   : > { %v1273_v45 = vpop.eup %1272 }
 0x3f5   : > { %v376_v49 = vmul.f32 %v1273_v45, %v374_v48 }
 0x458   : > { %v379_v46 = vpop.permute.xlu0 %378 }
 0x459   : > { %v381_v47 = vmul.f32 %v1273_v45, %v379_v46 }
 0x45b   : > { %383 = vrot.lane.b32.xlu0 %v381_v47, %s1429_s8 }
 0x4cd   : > { %v384_v50 = vpop.permute.xlu0 %383 }
 0x4ce   : > { %v386_v51 = vadd.f32 %v384_v50, %v376_v49 }
 0x4d0   : > { %1274 = vtanh.f32 %v386_v51 }
 0x4da   : > { %v1275_v52 = vpop.eup %1274 }
 0x4db   : > { %389 = vrot.lane.b32.xlu1 %v1275_v52, %s1429_s8 }
 0x4df   : > { %401 = vrot.lane.b32.xlu1 %v386_v51, %s1430_s28 }
 0x54d   : > { %v390_v53 = vpop.permute.xlu1 %389 }
 0x54e   : > { %v392_v54 = vmul.f32 %v1273_v45, %v390_v53 }
 0x550   : > { %396 = vrot.lane.b32.xlu0 %v392_v54, %s1431_s29  ;;  %v1435_v54 = vmov 4  }
 0x551   : > { %v402_v57 = vpop.permute.xlu1 %401  ;;  %v579_v55 = vsel %vm216_vm1, 3, %v1435_v54 }
 0x552   : > { %v404_v58 = vsel %vm394_vm6, %v402_v57, %v311_v31  ;;  %vm580_vm8 = vcmp.lt.s32.totalorder %v579_v55, %v1631_v29 }
 0x553   : > { %466 = vrot.lane.b32.xlu1 %v404_v58, %s1429_s8 }
 0x5c2   : > { %v397_v59 = vpop.permute.xlu0 %396 }
 0x5c3   : > { %v399_v60 = vsel %vm394_vm6, %v397_v59, %v306_v33  ;;  %v405_v61 = vsel %vm394_vm6, %v397_v59, 0.0 }
 0x5c4   : > { %1068 = vst.msk [vmem:[%s1636_s5 + $0x8] sm:$0xff] %vm312_vm3, %v405_v61  ;;  %v413_v62 = vpack.c.bf16 %v399_v60, %v399_v60 }
 0x5c5   : > { %1069 = vst.msk [vmem:[%s1636_s5 + $0x30] sm:$0xff] %vm315_vm4, %v405_v61  ;;  %v467_v17 = vpop.permute.xlu1 %466 }
 0x5c6   : > { %1148 = vmatmul.mubr.msk.bf16.vlgmr.msra.gmra.mrb[4].mxu0 %vm231_vm5, %v413_v62  ;;  %v1080_v62 = vld [vmem:[%s1573_s17 + $0x10] sm:$0xff]  }
 0x5c7   : > { %1160 = vmatpush3.bf16.msra.mxu0 %v1590_v2  ;;  %1163 = vmatprep.mubr.msk.bf16.mxu0 %vm1427_vm0, %v1426_v0  ;;  %v598_v63 = vunpack.c.l.bf16 %v1080_v62 }
 0x5c8   : > { %1161 = vmatprep.subr.bf16.mxu0 %v1426_v0 }
 0x5cb   : > { %1162 = vmatpush3.bf16.msra.mxu0 %v1596_v3 }
 0x5cc   : > { %1175 = vmatprep.subr.bf16.mxu0 %v1426_v0 }
 0x699   : > { %v451_v5 = vpop.f32.mrb[4].mxu0 }
 0x69a   : > { %v457_v6 = vadd.f32 %v451_v5, %v412_v4  ;;  %v1149_v7 = vpop.f32.mrb[5].mxu0 }
 0x69b   : > { %v454_v8 = vpop.f32.mrb[6].mxu0 }
 0x69c   : > { %1276 = vtanh.f32 %v457_v6  ;;  %v1150_v9 = vpop.f32.mrb[7].mxu0  ;;  %v1072_v11 = vmul.f32 -1.442695, %v457_v6 }
 0x69e   : > { %1278 = vpow2.f32 %v1072_v11 }
 0x6a6   : > { %v1277_v10 = vpop.eup %1276 }
 0x6a7   : > { %471 = vrot.lane.b32.xlu0 %v1277_v10, %s1429_s8 }
 0x6a8   : > { %v1279_v12 = vpop.eup %1278 }
 0x6a9   : > { %v461_v13 = vadd.f32 1.0, %v1279_v12 }
 0x6ab   : > { %1280 = vrcp.f32 %v461_v13 }
 0x6b5   : > { %v1281_v14 = vpop.eup %1280 }
 0x6b6   : > { %v469_v18 = vmul.f32 %v1281_v14, %v467_v17 }
 0x719   : > { %v472_v15 = vpop.permute.xlu0 %471 }
 0x71a   : > { %v474_v16 = vmul.f32 %v1281_v14, %v472_v15 }
 0x71c   : > { %476 = vrot.lane.b32.xlu0 %v474_v16, %s1429_s8 }
 0x78e   : > { %v477_v19 = vpop.permute.xlu0 %476 }
 0x78f   : > { %v479_v20 = vadd.f32 %v477_v19, %v469_v18 }
 0x791   : > { %1282 = vtanh.f32 %v479_v20 }
 0x79b   : > { %v1283_v21 = vpop.eup %1282 }
 0x79c   : > { %482 = vrot.lane.b32.xlu1 %v1283_v21, %s1429_s8 }
 0x7a0   : > { %494 = vrot.lane.b32.xlu1 %v479_v20, %s1430_s28 }
 0x80e   : > { %v483_v22 = vpop.permute.xlu1 %482 }
 0x80f   : > { %v485_v23 = vmul.f32 %v1281_v14, %v483_v22 }
 0x811   : > { %489 = vrot.lane.b32.xlu0 %v485_v23, %s1431_s29  ;;  %v1436_v23 = vmov 3  }
 0x812   : > { %v495_v27 = vpop.permute.xlu1 %494  ;;  %v672_v24 = vsel %vm216_vm1, 4, %v1436_v23 }
 0x813   : > { %v497_v28 = vsel %vm487_vm7, %v495_v27, %v404_v58  ;;  %vm673_vm9 = vcmp.lt.s32.totalorder %v672_v24, %v1631_v29 }
 0x814   : > { %559 = vrot.lane.b32.xlu1 %v497_v28, %s1429_s8 }
 0x883   : > { %v490_v30 = vpop.permute.xlu0 %489 }
 0x884   : > { %v492_v31 = vsel %vm487_vm7, %v490_v30, %v399_v60  ;;  %v498_v32 = vsel %vm487_vm7, %v490_v30, 0.0 }
 0x885   : > { %1073 = vst.msk [vmem:[%s1636_s5 + $0x10] sm:$0xff] %vm312_vm3, %v498_v32  ;;  %v506_v33 = vpack.c.bf16 %v492_v31, %v492_v31 }
 0x886   : > { %1074 = vst.msk [vmem:[%s1636_s5 + $0x28] sm:$0xff] %vm315_vm4, %v498_v32  ;;  %v560_v47 = vpop.permute.xlu1 %559 }
 0x887   : > { %1156 = vmatmul.mubr.msk.bf16.vlgmr.msra.gmra.mrb[4].mxu1 %vm231_vm5, %v506_v33  ;;  %v689_v33 = vunpack.c.h.bf16 %v1080_v62 }
 0x888   : > { %1168 = vmatpush3.bf16.msra.mxu1 %v1590_v2  ;;  %1171 = vmatprep.mubr.msk.bf16.mxu1 %vm1427_vm0, %v1426_v0 }
 0x889   : > { %1169 = vmatprep.subr.bf16.mxu1 %v1426_v0 }
 0x88c   : > { %1170 = vmatpush3.bf16.msra.mxu1 %v1596_v3 }
 0x88d   : > { %1183 = vmatprep.subr.bf16.mxu1 %v1426_v0 }
 0x95a   : > { %v544_v35 = vpop.f32.mrb[4].mxu1 }
 0x95b   : > { %v550_v36 = vadd.f32 %v544_v35, %v505_v34  ;;  %v1157_v37 = vpop.f32.mrb[5].mxu1 }
 0x95c   : > { %v547_v38 = vpop.f32.mrb[6].mxu1 }
 0x95d   : > { %1284 = vtanh.f32 %v550_v36  ;;  %v1158_v39 = vpop.f32.mrb[7].mxu1  ;;  %v1077_v41 = vmul.f32 -1.442695, %v550_v36 }
 0x95f   : > { %1286 = vpow2.f32 %v1077_v41 }
 0x967   : > { %v1285_v40 = vpop.eup %1284 }
 0x968   : > { %564 = vrot.lane.b32.xlu0 %v1285_v40, %s1429_s8 }
 0x969   : > { %v1287_v42 = vpop.eup %1286 }
 0x96a   : > { %v554_v43 = vadd.f32 1.0, %v1287_v42 }
 0x96c   : > { %1288 = vrcp.f32 %v554_v43 }
 0x976   : > { %v1289_v44 = vpop.eup %1288 }
 0x977   : > { %v562_v48 = vmul.f32 %v1289_v44, %v560_v47 }
 0x9da   : > { %v565_v45 = vpop.permute.xlu0 %564 }
 0x9db   : > { %v567_v46 = vmul.f32 %v1289_v44, %v565_v45 }
 0x9dd   : > { %569 = vrot.lane.b32.xlu0 %v567_v46, %s1429_s8 }
 0xa4f   : > { %v570_v49 = vpop.permute.xlu0 %569 }
 0xa50   : > { %v572_v50 = vadd.f32 %v570_v49, %v562_v48 }
 0xa52   : > { %1290 = vtanh.f32 %v572_v50 }
 0xa5c   : > { %v1291_v51 = vpop.eup %1290 }
 0xa5d   : > { %575 = vrot.lane.b32.xlu1 %v1291_v51, %s1429_s8 }
 0xa61   : > { %587 = vrot.lane.b32.xlu1 %v572_v50, %s1430_s28  ;;  %v1437_v50 = vmov 2  }
 0xa62   : > { %v763_v51 = vsel %vm216_vm1, 5, %v1437_v50 }
 0xa63   : > { %vm764_vm10 = vcmp.lt.s32.totalorder %v763_v51, %v1631_v29 }
 0xacf   : > { %v576_v52 = vpop.permute.xlu1 %575 }
 0xad0   : > { %v578_v53 = vmul.f32 %v1289_v44, %v576_v52 }
 0xad2   : > { %582 = vrot.lane.b32.xlu0 %v578_v53, %s1431_s29 }
 0xad3   : > { %v588_v56 = vpop.permute.xlu1 %587 }
 0xad4   : > { %v590_v57 = vsel %vm580_vm8, %v588_v56, %v497_v28 }
 0xad5   : > { %652 = vrot.lane.b32.xlu1 %v590_v57, %s1429_s8 }
 0xb44   : > { %v583_v58 = vpop.permute.xlu0 %582 }
 0xb45   : > { %v585_v59 = vsel %vm580_vm8, %v583_v58, %v492_v31  ;;  %v591_v60 = vsel %vm580_vm8, %v583_v58, 0.0  ;;  %v1090_v58 = vld [vmem:[%s1573_s17 + $0x18] sm:$0xff]  }
 0xb46   : > { %1078 = vst.msk [vmem:[%s1636_s5 + $0x18] sm:$0xff] %vm312_vm3, %v591_v60  ;;  %v599_v61 = vpack.c.bf16 %v585_v59, %v585_v59 }
 0xb47   : > { %1079 = vst.msk [vmem:[%s1636_s5 + $0x20] sm:$0xff] %vm315_vm4, %v591_v60  ;;  %v653_v16 = vpop.permute.xlu1 %652 }
 0xb48   : > { %1164 = vmatmul.mubr.msk.bf16.vlgmr.msra.gmra.mrb[8].mxu0 %vm231_vm5, %v599_v61 }
 0xb49   : > { %1176 = vmatpush3.bf16.msra.mxu0 %v1590_v2  ;;  %1179 = vmatprep.mubr.msk.bf16.mxu0 %vm1427_vm0, %v1426_v0 }
 0xb4a   : > { %1177 = vmatprep.subr.bf16.mxu0 %v1426_v0 }
 0xb4d   : > { %1178 = vmatpush3.bf16.msra.mxu0 %v1596_v3 }
 0xc1b   : > { %v637_v4 = vpop.f32.mrb[8].mxu0 }
 0xc1c   : > { %v643_v5 = vadd.f32 %v637_v4, %v598_v63  ;;  %v1165_v6 = vpop.f32.mrb[9].mxu0 }
 0xc1d   : > { %v640_v7 = vpop.f32.mrb[10].mxu0 }
 0xc1e   : > { %1292 = vtanh.f32 %v643_v5  ;;  %v1166_v8 = vpop.f32.mrb[11].mxu0  ;;  %v1082_v10 = vmul.f32 -1.442695, %v643_v5 }
 0xc20   : > { %1294 = vpow2.f32 %v1082_v10 }
 0xc28   : > { %v1293_v9 = vpop.eup %1292 }
 0xc29   : > { %657 = vrot.lane.b32.xlu0 %v1293_v9, %s1429_s8 }
 0xc2a   : > { %v1295_v11 = vpop.eup %1294 }
 0xc2b   : > { %v647_v12 = vadd.f32 1.0, %v1295_v11 }
 0xc2d   : > { %1296 = vrcp.f32 %v647_v12 }
 0xc37   : > { %v1297_v13 = vpop.eup %1296 }
 0xc38   : > { %v655_v17 = vmul.f32 %v1297_v13, %v653_v16 }
 0xc9b   : > { %v658_v14 = vpop.permute.xlu0 %657 }
 0xc9c   : > { %v660_v15 = vmul.f32 %v1297_v13, %v658_v14 }
 0xc9e   : > { %662 = vrot.lane.b32.xlu0 %v660_v15, %s1429_s8 }
 0xd10   : > { %v663_v18 = vpop.permute.xlu0 %662 }
 0xd11   : > { %v665_v19 = vadd.f32 %v663_v18, %v655_v17 }
 0xd13   : > { %1298 = vtanh.f32 %v665_v19 }
 0xd1d   : > { %v1299_v20 = vpop.eup %1298 }
 0xd1e   : > { %668 = vrot.lane.b32.xlu1 %v1299_v20, %s1429_s8 }
 0xd22   : > { %680 = vrot.lane.b32.xlu1 %v665_v19, %s1430_s28  ;;  %v1438_v19 = vmov 1  }
 0xd23   : > { %v854_v20 = vsel %vm216_vm1, 6, %v1438_v19 }
 0xd24   : > { %vm855_vm11 = vcmp.lt.s32.totalorder %v854_v20, %v1631_v29 }
 0xd90   : > { %v669_v21 = vpop.permute.xlu1 %668 }
 0xd91   : > { %v671_v22 = vmul.f32 %v1297_v13, %v669_v21 }
 0xd93   : > { %675 = vrot.lane.b32.xlu0 %v671_v22, %s1431_s29 }
 0xd94   : > { %v681_v25 = vpop.permute.xlu1 %680 }
 0xd95   : > { %v683_v27 = vsel %vm673_vm9, %v681_v25, %v590_v57 }
 0xd96   : > { %743 = vrot.lane.b32.xlu1 %v683_v27, %s1429_s8 }
 0xe05   : > { %v676_v28 = vpop.permute.xlu0 %675 }
 0xe06   : > { %v678_v30 = vsel %vm673_vm9, %v676_v28, %v585_v59  ;;  %v684_v31 = vsel %vm673_vm9, %v676_v28, 0.0  ;;  %v780_v59 = vunpack.c.l.bf16 %v1090_v58  ;;  %v871_v28 = vunpack.c.h.bf16 %v1090_v58 }
 0xe07   : > { %1083 = vst.msk [vmem:[%s1636_s5 + $0x20] sm:$0xff] %vm312_vm3, %v684_v31  ;;  %v690_v32 = vpack.c.bf16 %v678_v30, %v678_v30 }
 0xe08   : > { %1084 = vst.msk [vmem:[%s1636_s5 + $0x18] sm:$0xff] %vm315_vm4, %v684_v31 }
 0xe09   : > { %1172 = vmatmul.mubr.msk.bf16.vlgmr.msra.gmra.mrb[8].mxu1 %vm231_vm5, %v690_v32 }
 0xe0a   : > { %1184 = vmatpush3.bf16.msra.mxu1 %v1590_v2  ;;  %1187 = vmatprep.mubr.msk.bf16.mxu1 %vm1427_vm0, %v1426_v0 }
 0xe0b   : > { %1185 = vmatprep.subr.bf16.mxu1 %v1426_v0 }
 0xe0e   : > { %1186 = vmatpush3.bf16.msra.mxu1 %v1596_v3  ;;  %v744_v3 = vpop.permute.xlu1 %743 }
 0xedc   : > { %v728_v34 = vpop.f32.mrb[8].mxu1 }
 0xedd   : > { %v734_v35 = vadd.f32 %v728_v34, %v689_v33  ;;  %v1173_v36 = vpop.f32.mrb[9].mxu1 }
 0xede   : > { %v731_v37 = vpop.f32.mrb[10].mxu1 }
 0xedf   : > { %1300 = vtanh.f32 %v734_v35  ;;  %v1174_v38 = vpop.f32.mrb[11].mxu1  ;;  %v1087_v40 = vmul.f32 -1.442695, %v734_v35 }
 0xee1   : > { %1302 = vpow2.f32 %v1087_v40 }
 0xee9   : > { %v1301_v39 = vpop.eup %1300 }
 0xeea   : > { %748 = vrot.lane.b32.xlu0 %v1301_v39, %s1429_s8 }
 0xeeb   : > { %v1303_v2 = vpop.eup %1302 }
 0xeec   : > { %v738_v41 = vadd.f32 1.0, %v1303_v2 }
 0xeee   : > { %1304 = vrcp.f32 %v738_v41 }
 0xef8   : > { %v1305_v42 = vpop.eup %1304 }
 0xef9   : > { %v746_v44 = vmul.f32 %v1305_v42, %v744_v3 }
 0xf5c   : > { %v749_v43 = vpop.permute.xlu0 %748 }
 0xf5d   : > { %v751_v0 = vmul.f32 %v1305_v42, %v749_v43 }
 0xf5f   : > { %753 = vrot.lane.b32.xlu0 %v751_v0, %s1429_s8 }
 0xfd1   : > { %v754_v45 = vpop.permute.xlu0 %753 }
 0xfd2   : > { %v756_v46 = vadd.f32 %v754_v45, %v746_v44 }
 0xfd4   : > { %1306 = vtanh.f32 %v756_v46 }
 0xfde   : > { %v1307_v47 = vpop.eup %1306 }
 0xfdf   : > { %759 = vrot.lane.b32.xlu1 %v1307_v47, %s1429_s8 }
 0xfe3   : > { %771 = vrot.lane.b32.xlu1 %v756_v46, %s1430_s28  ;;  %v945_v46 = vsel %vm216_vm1, 7, %v1428_v1 }
 0xfe4   : > { %vm946_vm12 = vcmp.lt.s32.totalorder %v945_v46, %v1631_v29 }
0x1051   : > { %v760_v48 = vpop.permute.xlu1 %759 }
0x1052   : > { %v762_v49 = vmul.f32 %v1305_v42, %v760_v48 }
0x1054   : > { %766 = vrot.lane.b32.xlu0 %v762_v49, %s1431_s29 }
0x1055   : > { %v772_v52 = vpop.permute.xlu1 %771 }
0x1056   : > { %v774_v53 = vsel %vm764_vm10, %v772_v52, %v683_v27 }
0x1057   : > { %834 = vrot.lane.b32.xlu1 %v774_v53, %s1429_s8 }
0x10c6   : > { %v767_v54 = vpop.permute.xlu0 %766 }
0x10c7   : > { %v769_v55 = vsel %vm764_vm10, %v767_v54, %v678_v30  ;;  %v775_v56 = vsel %vm764_vm10, %v767_v54, 0.0 }
0x10c8   : > { %1088 = vst.msk [vmem:[%s1636_s5 + $0x28] sm:$0xff] %vm312_vm3, %v775_v56  ;;  %v781_v57 = vpack.c.bf16 %v769_v55, %v769_v55 }
0x10c9   : > { %1089 = vst.msk [vmem:[%s1636_s5 + $0x10] sm:$0xff] %vm315_vm4, %v775_v56  ;;  %v835_v12 = vpop.permute.xlu1 %834 }
0x10ca   : > { %1180 = vmatmul.mubr.msk.bf16.vlgmr.msra.gmra.mrb[12].mxu0 %vm231_vm5, %v781_v57 }
0x119d   : > { %v819_v60 = vpop.f32.mrb[12].mxu0 }
0x119e   : > { %v825_v61 = vadd.f32 %v819_v60, %v780_v59  ;;  %v1181_v62 = vpop.f32.mrb[13].mxu0 }
0x119f   : > { %v822_v63 = vpop.f32.mrb[14].mxu0 }
0x11a0   : > { %1308 = vtanh.f32 %v825_v61  ;;  %v1182_v4 = vpop.f32.mrb[15].mxu0  ;;  %v1092_v6 = vmul.f32 -1.442695, %v825_v61 }
0x11a2   : > { %1310 = vpow2.f32 %v1092_v6 }
0x11aa   : > { %v1309_v5 = vpop.eup %1308 }
0x11ab   : > { %839 = vrot.lane.b32.xlu0 %v1309_v5, %s1429_s8 }
0x11ac   : > { %v1311_v7 = vpop.eup %1310 }
0x11ad   : > { %v829_v8 = vadd.f32 1.0, %v1311_v7 }
0x11af   : > { %1312 = vrcp.f32 %v829_v8 }
0x11b9   : > { %v1313_v9 = vpop.eup %1312 }
0x11ba   : > { %v837_v13 = vmul.f32 %v1313_v9, %v835_v12 }
0x121d   : > { %v840_v10 = vpop.permute.xlu0 %839 }
0x121e   : > { %v842_v11 = vmul.f32 %v1313_v9, %v840_v10 }
0x1220   : > { %844 = vrot.lane.b32.xlu0 %v842_v11, %s1429_s8 }
0x1292   : > { %v845_v14 = vpop.permute.xlu0 %844 }
0x1293   : > { %v847_v15 = vadd.f32 %v845_v14, %v837_v13 }
0x1295   : > { %1314 = vtanh.f32 %v847_v15 }
0x129f   : > { %v1315_v16 = vpop.eup %1314 }
0x12a0   : > { %850 = vrot.lane.b32.xlu1 %v1315_v16, %s1429_s8 }
0x12a4   : > { %862 = vrot.lane.b32.xlu1 %v847_v15, %s1430_s28 }
0x1312   : > { %v851_v17 = vpop.permute.xlu1 %850 }
0x1313   : > { %v853_v18 = vmul.f32 %v1313_v9, %v851_v17 }
0x1315   : > { %857 = vrot.lane.b32.xlu0 %v853_v18, %s1431_s29 }
0x1316   : > { %v863_v21 = vpop.permute.xlu1 %862 }
0x1317   : > { %v865_v22 = vsel %vm855_vm11, %v863_v21, %v774_v53 }
0x1318   : > { %925 = vrot.lane.b32.xlu1 %v865_v22, %s1429_s8 }
0x1387   : > { %v858_v23 = vpop.permute.xlu0 %857 }
0x1388   : > { %v860_v24 = vsel %vm855_vm11, %v858_v23, %v769_v55  ;;  %v866_v25 = vsel %vm855_vm11, %v858_v23, 0.0 }
0x1389   : > { %1093 = vst.msk [vmem:[%s1636_s5 + $0x30] sm:$0xff] %vm312_vm3, %v866_v25  ;;  %v872_v27 = vpack.c.bf16 %v860_v24, %v860_v24 }
0x138a   : > { %1094 = vst.msk [vmem:[%s1636_s5 + $0x8] sm:$0xff] %vm315_vm4, %v866_v25  ;;  %v926_v41 = vpop.permute.xlu1 %925 }
0x138b   : > { %1188 = vmatmul.mubr.msk.bf16.vlgmr.msra.gmra.mrb[12].mxu1 %vm231_vm5, %v872_v27 }
0x145e   : > { %v910_v30 = vpop.f32.mrb[12].mxu1 }
0x145f   : > { %v916_v31 = vadd.f32 %v910_v30, %v871_v28  ;;  %v1189_v32 = vpop.f32.mrb[13].mxu1 }
0x1460   : > { %v913_v33 = vpop.f32.mrb[14].mxu1 }
0x1461   : > { %1316 = vtanh.f32 %v916_v31  ;;  %v1190_v34 = vpop.f32.mrb[15].mxu1  ;;  %v1097_v36 = vmul.f32 -1.442695, %v916_v31 }
0x1463   : > { %1318 = vpow2.f32 %v1097_v36 }
0x146b   : > { %v1317_v35 = vpop.eup %1316 }
0x146c   : > { %930 = vrot.lane.b32.xlu0 %v1317_v35, %s1429_s8 }
0x146d   : > { %v1319_v37 = vpop.eup %1318 }
0x146e   : > { %v920_v38 = vadd.f32 1.0, %v1319_v37 }
0x1470   : > { %1320 = vrcp.f32 %v920_v38 }
0x147a   : > { %v1321_v39 = vpop.eup %1320 }
0x147b   : > { %v928_v42 = vmul.f32 %v1321_v39, %v926_v41 }
0x14de   : > { %v931_v40 = vpop.permute.xlu0 %930 }
0x14df   : > { %v933_v2 = vmul.f32 %v1321_v39, %v931_v40 }
0x14e1   : > { %935 = vrot.lane.b32.xlu0 %v933_v2, %s1429_s8 }
0x1553   : > { %v936_v43 = vpop.permute.xlu0 %935 }
0x1554   : > { %v938_v0 = vadd.f32 %v936_v43, %v928_v42 }
0x1556   : > { %1322 = vtanh.f32 %v938_v0 }
0x1560   : > { %v1323_v3 = vpop.eup %1322 }
0x1561   : > { %941 = vrot.lane.b32.xlu1 %v1323_v3, %s1429_s8  ;;  %s1358_s8 = sshll.u32 %s1439_s7, 4  ;;  %s1359_s8 = int_to_ptr.vmem [resolvable:$false] %s1358_s8 }
0x1562   : > { %s1360_s19 = scalar_lea.vmem %s1359_s8, 2048  ;;  %p1361_p10 = scmp.lt.s32.totalorder %s1773_s11, %s1359_s8 }
0x1563   : > { %p1362_p1 = scmp.lt.s32.totalorder %s1360_s19, %s1354_s6 }
0x1565   : > { %p1363_p3 = por %p1362_p1, %p1361_p10 }
0x1567   : > { %p1364_p5 = pnand %p1363_p3, %p1357_p4 }
0x15d3   : > { %v942_v44 = vpop.permute.xlu1 %941 }
0x15d4   : > { %v944_v45 = vmul.f32 %v1321_v39, %v942_v44 }
0x15d6   : > { %948 = vrot.lane.b32.xlu0 %v944_v45, %s1431_s29 }
0x1648   : > { %v949_v47 = vpop.permute.xlu0 %948 }
0x1649   : > { %v951_v48 = vsel %vm946_vm12, %v949_v47, 0.0 }
0x164a   : > { %1098 = vst.msk [vmem:[%s1636_s5 + $0x38] sm:$0xff] %vm312_vm3, %v951_v48 }
0x164b   : > { %953 = vst.msk [vmem:[%s1636_s5] sm:$0xff] %vm315_vm4, %v951_v48 }
0x164c   : > { %1367 = shalt.err (!%p1364_p5)
}
0x164d   : > { %s1368_s20 = scalar_lea.hbm %s1771_s23, 1024  ;;  %s1372_s27 = scalar_lea.hbm %s1825_s3, 2048 }
0x164e   : > { %p1369_p7 = scmp.ne.s32.totalorder %s1771_s23, %s1368_s20  ;;  %p1373_p0 = scmp.lt.u32.totalorder %s1771_s23, %s1825_s3 }
0x164f   : > { %p1374_p2 = scmp.lt.u32.totalorder %s1372_s27, %s1368_s20  ;;  %p1376_p11 = scmp.lt.u32.totalorder %s1368_s20, %s1771_s23 }
0x1650   : > { %p1370_p8 = pnand %p1369_p7, %p1833_p12 }
0x1651   : > { %p1375_p6 = por %p1374_p2, %p1373_p0 }
0x1652   : > { %p1371_p9 = pneg %p1370_p8 }
0x1653   : > { %p1377_p13 = por %p1376_p11, %p1375_p6 }
0x1655   : > { %p1378_p4 = pnand %p1377_p13, %p1371_p9 }
0x1657   : > { %1381 = shalt.err (!%p1378_p4)
}
0x1658   : > { %s1440_s30 = smov 128   ;;  %s1441_s5 = smov 256  }
0x1659   : > { %s1442_s10 = smov 8  }
0x165a   : > { %1193 = dma.vmem_to_hbm [thread:$0]  (%p1833_p12), %s1773_s11, 1024, %s1771_s23, %s955_s16, %s1440_s30, %s1441_s5, %s1442_s10  }
0x165b PF: > { %s982_s17 = sand.u32 1, %s1408_s12   ;;  %p1834_p10 = scmp.ne.s32.totalorder %s1830_s25, 0 }
0x165c   : > { %p1835_p1 = scmp.ge.s32.totalorder %s1420_s15, 2  ;;  %s983_s4 = scalar_lea.sflag [#allocation4], %s982_s17 }
0x165e   : > { %p1200_p3 = pnand %p1835_p1, %p1834_p10 }
0x1660   : > { %1403 = dma.done.wait (!%p1200_p3), %s983_s4, 1024  }
0x1661   : > { %1405 = vsyncadd (!%p1200_p3), %s983_s4, 4294966272  ;;  %p16_p5 = scmp.ge.s32.totalorder %s1488_s18, 4   ;;  %s1836_s12 = smov %s1412_s13 }
0x1662   : > { %s1837_s13 = smov %s1416_s14  ;;  %s1838_s14 = smov %s1500_s21 }
0x1663   : > { %s1839_s15 = smov %s1488_s18  ;;  %18 = sbr.rel (!%p16_p5) target bundleno = 5 (0x5), region = 94 }
0x166a   :  { %988 = vsyncpa [#allocation3], 1 }
0x166b   :  { %990 = vsyncpa [#allocation3 + $0x1], 1 }
0x166c   :  { %991 = vsyncpa [#allocation4], 1 }
0x166d   :  { %993 = vsyncpa [#allocation4 + $0x1], 1 }

</bundles_post_ra>
